<compile_context>
chip_gen: v5e
topology: v5e:2x2
jax: 0.10.0
libtpu: 0.0.40
codegen_flags: <defaults>
</compile_context>

<pallas_src>
import math

import jax
import jax.numpy as jnp
from jax import lax
from jax.experimental import pallas as pl
from jax.experimental.pallas import tpu as pltpu


# ----------------------------- in-kernel math ------------------------------

def _erf(x):
    # Abramowitz & Stegun 7.1.26 (max abs err 1.5e-7): keeps exact-GELU
    # (torch.nn.GELU() default) semantics well below the bf16 matmul noise.
    a1, a2, a3, a4, a5 = (0.254829592, -0.284496736, 1.421413741,
                          -1.453152027, 1.061405429)
    p = 0.3275911
    sgn = jnp.where(x >= 0.0, 1.0, -1.0)
    ax = jnp.abs(x)
    t = 1.0 / (1.0 + p * ax)
    poly = ((((a5 * t + a4) * t + a3) * t + a2) * t + a1) * t
    return sgn * (1.0 - poly * jnp.exp(-ax * ax))


def _gelu(x):
    # Exact (erf-based) GELU, matching torch.nn.GELU() default.
    # TODO(synk): on v6e/v7x a bf16/tanh variant could offload to the EUP if
    # profiling shows the VALU slot is binding.
    return 0.5 * x * (1.0 + _erf(x * 0.7071067811865476))


def _layernorm(x, gamma, beta, eps=1e-5):
    mean = jnp.mean(x, axis=-1, keepdims=True)
    var = jnp.mean((x - mean) * (x - mean), axis=-1, keepdims=True)
    return (x - mean) * lax.rsqrt(var + eps) * gamma + beta


def _vmem_limit_bytes():
    # Budget ~75% of physical VMEM: v5e/v6e (128 MiB) -> 96 MiB (bigger tiles
    # amortize per-step overhead), v7x (64 MiB) -> 48 MiB.
    try:
        cap = int(getattr(pltpu.get_tpu_info(), "vmem_capacity_bytes",
                          128 * 1024 * 1024))
    except Exception:
        cap = 128 * 1024 * 1024
    return min((cap * 3) // 4, 96 * 1024 * 1024)


# ------------------------- kernel 1: layer stream ---------------------------

def _make_layer_kernel(bt, n_head, head_size):
    H, Dh = n_head, head_size
    E = H * Dh
    scale = 1.0 / math.sqrt(Dh)

    def kernel(mask_ref, x_ref,
               wqkv_ref, bqkv_ref,              # fused q/k/v projection (per layer)
               wp_ref, bp_ref,                  # output projection, head-folded
               ln1g_ref, ln1b_ref, ln2g_ref, ln2b_ref,
               w1_ref, b1_ref, w2_ref, b2_ref,  # MLP (per layer)
               out_ref,                         # residual stream (VMEM-resident
                                                # across the layer axis)
               qkv_scr):                        # (bt, T, 3E) bf16 scratch
        l = pl.program_id(1)
        T = mask_ref.shape[0]

        # Load the residual stream once per batch tile (layer axis innermost);
        # out_ref doubles as the accumulator since its block index is constant
        # in l (Pallas revisiting semantics -> single HBM writeback at the end).
        @pl.when(l == 0)
        def _():
            out_ref[...] = x_ref[...]

        x = out_ref[...].reshape(bt * T, E)      # (bt*T, E) float32
        mask = mask_ref[...]                     # (T, T) additive 0 / -1e30

        # ---- attention sub-block: x = x + proj(multi_head_attn(ln1(x)))
        h = _layernorm(x, ln1g_ref[0], ln1b_ref[0])
        qkv = jnp.dot(h.astype(jnp.bfloat16), wqkv_ref[0],
                      preferred_element_type=jnp.float32) + bqkv_ref[0]  # (bt*T,3E)
        # Park the fused QKV result once in VMEM; per-head operands are then
        # plain strided loads (no value-slice relayouts, no (H,T,T) tensors).
        qkv_scr[...] = qkv.astype(jnp.bfloat16).reshape(bt, T, 3 * E)

        att_rows = []
        for b in range(bt):                      # static, bt is tiny
            att = jnp.zeros((T, E), jnp.float32)
            for hd in range(H):                  # head loop: peak score mem = T*T
                c = hd * Dh
                qh = qkv_scr[b, :, c:c + Dh]                 # (T, Dh) bf16
                kh = qkv_scr[b, :, E + c:E + c + Dh]
                vh = qkv_scr[b, :, 2 * E + c:2 * E + c + Dh]
                # q @ k^T without materializing a transpose:
                s = lax.dot_general(qh, kh, (((1,), (1,)), ((), ())),
                                    preferred_element_type=jnp.float32)  # (T,T)
                s = s * scale + mask
                s = s - jnp.max(s, axis=-1, keepdims=True)
                p = jnp.exp(s)
                p = p * pl.reciprocal(jnp.sum(p, axis=-1, keepdims=True),
                                      approx=True)
                oh = jnp.dot(p.astype(jnp.bfloat16), vh,
                             preferred_element_type=jnp.float32)         # (T,Dh)
                # fused per-head output projection (MXU accumulate, f32):
                #   concat_h(o_h) @ Wp == sum_h o_h @ Wp[h]
                att = att + jnp.dot(oh.astype(jnp.bfloat16), wp_ref[0, hd],
                                    preferred_element_type=jnp.float32)  # (T,E)
            att_rows.append(att)
        att_all = att_rows[0] if bt == 1 else jnp.concatenate(att_rows, axis=0)
        x = x + att_all + bp_ref[0]

        # ---- MLP sub-block: x = x + W2 @ gelu(W1 @ ln2(x))
        h2 = _layernorm(x, ln2g_ref[0], ln2b_ref[0])
        m = jnp.dot(h2.astype(jnp.bfloat16), w1_ref[0],
                    preferred_element_type=jnp.float32) + b1_ref[0]
        m = _gelu(m)
        m = jnp.dot(m.astype(jnp.bfloat16), w2_ref[0],
                    preferred_element_type=jnp.float32) + b2_ref[0]
        x = x + m

        out_ref[...] = x.reshape(bt, T, E)

    return kernel


# ---------------------- kernel 2: final LN + lm_head ------------------------

def _lm_head_kernel(x_ref, lnfg_ref, lnfb_ref, lmw_ref, lmb_ref, out_ref,
                    xn_scr):
    # LayerNorm once per sequence (vocab axis is innermost / sequential);
    # reuse the bf16-normalized activations for every vocab tile.
    @pl.when(pl.program_id(1) == 0)
    def _():
        xn_scr[...] = _layernorm(x_ref[0], lnfg_ref[...], lnfb_ref[...]
                                 ).astype(jnp.bfloat16)
    out_ref[0] = jnp.dot(xn_scr[...], lmw_ref[...],
                         preferred_element_type=jnp.float32) + lmb_ref[...]
    # TODO(synk): for very large vocabularies, emit bf16 logits and upcast in
    # the wrapper to halve the (T, V) writeback.


# -------------------------------- wrapper ----------------------------------

def gpt_forward(idx, params, config):
    """Embedding gather in plain JAX (glue); transformer stack in one
    layer-streamed Pallas kernel; final LN + lm_head in a vocab-tiled one."""
    B, T = idx.shape
    L, H, Dh = config["n_layer"], config["n_head"], config["head_size"]
    E = config["n_embed"]
    V = config["vocab_size"]
    assert E == H * Dh
    Vp = -(-V // 128) * 128                      # lane-dense padded vocab

    tok = jnp.take(params["tok_emb"], idx, axis=0)          # (B, T, E)
    pos = params["pos_emb"][:T]                              # (T, E)
    x = (tok + pos).astype(jnp.float32)

    bf16, f32 = jnp.bfloat16, jnp.float32
    vmem_limit = _vmem_limit_bytes()

    # ---- batch tiling: keep >= 2 parallel tiles (v7x megacore) while
    #      amortizing per-layer weight DMA over bt sequences per tile.
    num_bt = 2 if B >= 2 else 1
    bt = -(-B // num_bt)
    Bp = num_bt * bt
    if Bp != B:
        x = jnp.pad(x, ((0, Bp - B), (0, 0), (0, 0)))

    # Additive causal mask, hoisted out of the per-layer body.
    mask = jnp.where(jnp.tril(jnp.ones((T, T), bool)), 0.0, -1e30).astype(f32)

    # ---- pack weights: fused QKV (head-major columns), head-folded proj,
    #      bf16 matmul operands.
    def heads_to_cols(w):                                    # (L,H,E,Dh)->(L,E,H*Dh)
        return jnp.transpose(w, (0, 2, 1, 3)).reshape(L, E, H * Dh)

    wqkv = jnp.concatenate([heads_to_cols(params["wq"]),
                            heads_to_cols(params["wk"]),
                            heads_to_cols(params["wv"])], axis=-1).astype(bf16)
    bqkv = jnp.concatenate([params["bq"].reshape(L, 1, E),
                            params["bk"].reshape(L, 1, E),
                            params["bv"].reshape(L, 1, E)], axis=-1).astype(f32)
    wp = params["wp"].reshape(L, H, Dh, E).astype(bf16)      # head-folded proj

    layer_args = [wqkv, bqkv, wp, params["bp"],
                  params["ln1g"], params["ln1b"], params["ln2g"], params["ln2b"],
                  params["w1"].astype(bf16), params["b1"],
                  params["w2"].astype(bf16), params["b2"]]

    # Per-layer weights: stream one layer slice per grid step along the layer axis.
    def layer_spec(a):
        nd = a.ndim
        return pl.BlockSpec((1,) + a.shape[1:],
                            lambda b, l, _nd=nd: (l,) + (0,) * (_nd - 1))

    resid = pl.pallas_call(
        _make_layer_kernel(bt, H, Dh),
        out_shape=jax.ShapeDtypeStruct((Bp, T, E), jnp.float32),
        grid=(num_bt, L),
        in_specs=([pl.BlockSpec((T, T), lambda b, l: (0, 0)),
                   pl.BlockSpec((bt, T, E), lambda b, l: (b, 0, 0))]
                  + [layer_spec(a) for a in layer_args]),
        out_specs=pl.BlockSpec((bt, T, E), lambda b, l: (b, 0, 0)),
        scratch_shapes=[pltpu.VMEM((bt, T, 3 * E), bf16)],
        compiler_params=pltpu.CompilerParams(
            dimension_semantics=("parallel", "arbitrary"),
            vmem_limit_bytes=vmem_limit),
    )(mask, x, *layer_args)

    resid = resid[:B]                                        # drop batch padding

    # ---- final LayerNorm + lm_head, vocab-tiled (lm_head weight streamed).
    lmw = jnp.pad(params["lmw"], ((0, 0), (0, Vp - V))).astype(bf16)
    lmb = jnp.pad(params["lmb"], ((0, 0), (0, Vp - V))).astype(f32)
    tv = 512 if Vp % 512 == 0 else (256 if Vp % 256 == 0 else 128)
    nv = Vp // tv

    logits_padded = pl.pallas_call(
        _lm_head_kernel,
        out_shape=jax.ShapeDtypeStruct((B, T, Vp), jnp.float32),
        grid=(B, nv),
        in_specs=[pl.BlockSpec((1, T, E), lambda b, v: (b, 0, 0)),
                  pl.BlockSpec((1, E), lambda b, v: (0, 0)),
                  pl.BlockSpec((1, E), lambda b, v: (0, 0)),
                  pl.BlockSpec((E, tv), lambda b, v: (0, v)),
                  pl.BlockSpec((1, tv), lambda b, v: (0, v))],
        out_specs=pl.BlockSpec((1, T, tv), lambda b, v: (b, 0, v)),
        scratch_shapes=[pltpu.VMEM((T, E), bf16)],
        compiler_params=pltpu.CompilerParams(
            dimension_semantics=("parallel", "arbitrary"),
            vmem_limit_bytes=vmem_limit),
    )(resid, params["lnfg"], params["lnfb"], lmw, lmb)

    return logits_padded[:, :, :V]


# ---------------------- pure-JAX reference (for checking) ------------------

def gpt_reference(idx, params, config):
    T = idx.shape[1]
    x = jnp.take(params["tok_emb"], idx, axis=0) + params["pos_emb"][:T]
    scale = 1.0 / math.sqrt(config["head_size"])

    def ln(x, g, b):
        mu = jnp.mean(x, -1, keepdims=True)
        var = jnp.mean((x - mu) ** 2, -1, keepdims=True)
        return (x - mu) / jnp.sqrt(var + 1e-5) * g + b

    T_ = x.shape[1]
    mask = jnp.tril(jnp.ones((T_, T_), bool))
    for l in range(config["n_layer"]):
        h = ln(x, params["ln1g"][l], params["ln1b"][l])
        outs = []
        for hh in range(config["n_head"]):
            q = h @ params["wq"][l, hh] + params["bq"][l, hh]
            k = h @ params["wk"][l, hh] + params["bk"][l, hh]
            v = h @ params["wv"][l, hh] + params["bv"][l, hh]
            s = jnp.einsum("btd,bsd->bts", q, k) * scale
            s = jnp.where(mask, s, -jnp.inf)
            p = jax.nn.softmax(s, axis=-1)
            outs.append(jnp.einsum("bts,bsd->btd", p, v))
        att = jnp.concatenate(outs, -1) @ params["wp"][l] + params["bp"][l]
        x = x + att
        h2 = ln(x, params["ln2g"][l], params["ln2b"][l])
        m = jax.nn.gelu(h2 @ params["w1"][l] + params["b1"][l], approximate=False)
        m = m @ params["w2"][l] + params["b2"][l]
        x = x + m
    x = ln(x, params["lnfg"], params["lnfb"])
    return x @ params["lmw"] + params["lmb"]


# ----------------------------------- main -----------------------------------

def init_params(key, config):
    L, H = config["n_layer"], config["n_head"]
    E, Dh, V, BS = (config["n_embed"], config["head_size"],
                    config["vocab_size"], config["block_size"])
    ks = list(jax.random.split(key, 12))
    nrm = lambda k, shp: (0.02 * jax.random.normal(k, shp)).astype(jnp.float32)
    F4 = 4 * E
    return {
        "tok_emb": nrm(ks[0], (V, E)),
        "pos_emb": nrm(ks[1], (BS, E)),
        # per-head q/k/v Linears, pre-transposed to (in, out); biases init to 0.
        "wq": nrm(ks[2], (L, H, E, Dh)), "bq": jnp.zeros((L, H, 1, Dh), jnp.float32),
        "wk": nrm(ks[3], (L, H, E, Dh)), "bk": jnp.zeros((L, H, 1, Dh), jnp.float32),
        "wv": nrm(ks[4], (L, H, E, Dh)), "bv": jnp.zeros((L, H, 1, Dh), jnp.float32),
        "wp": nrm(ks[5], (L, E, E)),     "bp": jnp.zeros((L, 1, E), jnp.float32),
        "ln1g": jnp.ones((L, 1, E), jnp.float32), "ln1b": jnp.zeros((L, 1, E), jnp.float32),
        "ln2g": jnp.ones((L, 1, E), jnp.float32), "ln2b": jnp.zeros((L, 1, E), jnp.float32),
        "w1": nrm(ks[6], (L, E, F4)),    "b1": jnp.zeros((L, 1, F4), jnp.float32),
        "w2": nrm(ks[7], (L, F4, E)),    "b2": jnp.zeros((L, 1, E), jnp.float32),
        "lnfg": jnp.ones((1, E), jnp.float32), "lnfb": jnp.zeros((1, E), jnp.float32),
        "lmw": nrm(ks[8], (E, V)),       "lmb": jnp.zeros((1, V), jnp.float32),
    }


if __name__ == "__main__":
    config = dict(vocab_size=64, block_size=16, n_embed=32, n_head=4,
                  head_size=8, n_layer=2, dropout=0.0)

    key = jax.random.PRNGKey(0)
    kp, ki = jax.random.split(key)
    params = init_params(kp, config)

    B, T = 2, 8
    idx = jax.random.randint(ki, (B, T), 0, config["vocab_size"], dtype=jnp.int32)

    logits = gpt_forward(idx, params, config)
    logits = jax.block_until_ready(logits)

    ref = gpt_reference(idx, params, config)
    assert logits.shape == (B, T, config["vocab_size"])
    assert jnp.all(jnp.isfinite(logits))
    # bf16 matmul operands (f32 accumulation) + approx softmax reciprocal ->
    # loosened tolerance vs the f32 reference.
    assert jnp.allclose(logits, ref, atol=2e-2, rtol=2e-2), (
        float(jnp.max(jnp.abs(logits - ref))))

    # TODO(synk): targets / cross-entropy loss path and autoregressive generate()
    # (top-k + multinomial sampling) are host-side glue and not part of this kernel.
    print("KERNEL_OK")
</pallas_src>

<mosaic_0001>
module attributes {stable_mosaic.version = 11 : i64} {
  func.func @kernel(%arg0: i32, %arg1: i32, %arg2: memref<8x8xf32, #tpu.memory_space<vmem>>, %arg3: memref<1x8x32xf32, #tpu.memory_space<vmem>>, %arg4: memref<1x32x96xbf16, #tpu.memory_space<vmem>>, %arg5: memref<1x1x96xf32, #tpu.memory_space<vmem>>, %arg6: memref<1x4x8x32xbf16, #tpu.memory_space<vmem>>, %arg7: memref<1x1x32xf32, #tpu.memory_space<vmem>>, %arg8: memref<1x1x32xf32, #tpu.memory_space<vmem>>, %arg9: memref<1x1x32xf32, #tpu.memory_space<vmem>>, %arg10: memref<1x1x32xf32, #tpu.memory_space<vmem>>, %arg11: memref<1x1x32xf32, #tpu.memory_space<vmem>>, %arg12: memref<1x32x128xbf16, #tpu.memory_space<vmem>>, %arg13: memref<1x1x128xf32, #tpu.memory_space<vmem>>, %arg14: memref<1x128x32xbf16, #tpu.memory_space<vmem>>, %arg15: memref<1x1x32xf32, #tpu.memory_space<vmem>>, %arg16: memref<1x8x32xf32, #tpu.memory_space<vmem>>, %arg17: memref<1x8x96xbf16, #tpu.memory_space<vmem>>) attributes {dimension_semantics = [#tpu.dimension_semantics<parallel>, #tpu.dimension_semantics<arbitrary>], iteration_bounds = array<i64: 2, 2>, scalar_prefetch = 0 : i64, scratch_operands = 1 : i64, tpu.core_type = #tpu.core_type<tc>, window_params = [{pipeline_mode = #tpu.pipeline_mode<synchronous>, transform_indices = @transform_0, window_bounds = array<i64: 8, 8>}, {transform_indices = @transform_1, window_bounds = array<i64: 1, 8, 32>}, {transform_indices = @transform_2, window_bounds = array<i64: 1, 32, 96>}, {transform_indices = @transform_3, window_bounds = array<i64: 1, 1, 96>}, {transform_indices = @transform_4, window_bounds = array<i64: 1, 4, 8, 32>}, {transform_indices = @transform_5, window_bounds = array<i64: 1, 1, 32>}, {transform_indices = @transform_6, window_bounds = array<i64: 1, 1, 32>}, {transform_indices = @transform_7, window_bounds = array<i64: 1, 1, 32>}, {transform_indices = @transform_8, window_bounds = array<i64: 1, 1, 32>}, {transform_indices = @transform_9, window_bounds = array<i64: 1, 1, 32>}, {transform_indices = @transform_10, window_bounds = array<i64: 1, 32, 128>}, {transform_indices = @transform_11, window_bounds = array<i64: 1, 1, 128>}, {transform_indices = @transform_12, window_bounds = array<i64: 1, 128, 32>}, {transform_indices = @transform_13, window_bounds = array<i64: 1, 1, 32>}, {transform_indices = @transform_14, window_bounds = array<i64: 1, 8, 32>}]} {
    %c0_i32 = arith.constant 0 : i32
    %0 = arith.cmpi eq, %arg1, %c0_i32 : i32
    %1 = arith.extui %0 : i1 to i32
    %c0_i32_0 = arith.constant 0 : i32
    %2 = arith.cmpi ne, %1, %c0_i32_0 : i32
    scf.if %2 {
      %c0_135 = arith.constant 0 : index
      %c0_136 = arith.constant 0 : index
      %c0_137 = arith.constant 0 : index
      %247 = vector.load %arg3[%c0_135, %c0_136, %c0_137] : memref<1x8x32xf32, #tpu.memory_space<vmem>>, vector<1x8x32xf32>
      %c0_138 = arith.constant 0 : index
      %c0_139 = arith.constant 0 : index
      %c0_140 = arith.constant 0 : index
      %248 = vector.load %arg16[%c0_138, %c0_139, %c0_140] : memref<1x8x32xf32, #tpu.memory_space<vmem>>, vector<1x8x32xf32>
      tpu.vector_store %arg16[%c0_138, %c0_139, %c0_140], %247 {strides = array<i32>} : memref<1x8x32xf32, #tpu.memory_space<vmem>>, vector<1x8x32xf32>,
    } else {
    }
    %c0 = arith.constant 0 : index
    %c0_1 = arith.constant 0 : index
    %c0_2 = arith.constant 0 : index
    %3 = vector.load %arg16[%c0, %c0_1, %c0_2] : memref<1x8x32xf32, #tpu.memory_space<vmem>>, vector<1x8x32xf32>
    %4 = vector.shape_cast %3 : vector<1x8x32xf32> to vector<8x32xf32>
    %c0_3 = arith.constant 0 : index
    %c0_4 = arith.constant 0 : index
    %5 = vector.load %arg2[%c0_3, %c0_4] : memref<8x8xf32, #tpu.memory_space<vmem>>, vector<8x8xf32>
    %c0_5 = arith.constant 0 : index
    %c0_6 = arith.constant 0 : index
    %c0_7 = arith.constant 0 : index
    %6 = vector.load %arg8[%c0_5, %c0_6, %c0_7] : memref<1x1x32xf32, #tpu.memory_space<vmem>>, vector<1x1x32xf32>
    %7 = vector.shape_cast %6 : vector<1x1x32xf32> to vector<1x32xf32>
    %c0_8 = arith.constant 0 : index
    %c0_9 = arith.constant 0 : index
    %c0_10 = arith.constant 0 : index
    %8 = vector.load %arg9[%c0_8, %c0_9, %c0_10] : memref<1x1x32xf32, #tpu.memory_space<vmem>>, vector<1x1x32xf32>
    %9 = vector.shape_cast %8 : vector<1x1x32xf32> to vector<1x32xf32>
    %cst = arith.constant dense<0.000000e+00> : vector<8xf32>
    %10 = vector.multi_reduction <add>, %4, %cst [1] : vector<8x32xf32> to vector<8xf32>
    %11 = vector.shape_cast %10 : vector<8xf32> to vector<8x1xf32>
    %cst_11 = arith.constant 3.200000e+01 : f32
    %12 = vector.broadcast %cst_11 : f32 to vector<8x1xf32>
    %13 = arith.divf %11, %12 : vector<8x1xf32>
    %14 = vector.broadcast %13 : vector<8x1xf32> to vector<8x32xf32>
    %15 = arith.subf %4, %14 : vector<8x32xf32>
    %16 = vector.broadcast %13 : vector<8x1xf32> to vector<8x32xf32>
    %17 = arith.subf %4, %16 : vector<8x32xf32>
    %18 = arith.mulf %15, %17 : vector<8x32xf32>
    %cst_12 = arith.constant dense<0.000000e+00> : vector<8xf32>
    %19 = vector.multi_reduction <add>, %18, %cst_12 [1] : vector<8x32xf32> to vector<8xf32>
    %20 = vector.shape_cast %19 : vector<8xf32> to vector<8x1xf32>
    %cst_13 = arith.constant 3.200000e+01 : f32
    %21 = vector.broadcast %cst_13 : f32 to vector<8x1xf32>
    %22 = arith.divf %20, %21 : vector<8x1xf32>
    %23 = vector.broadcast %13 : vector<8x1xf32> to vector<8x32xf32>
    %24 = arith.subf %4, %23 : vector<8x32xf32>
    %cst_14 = arith.constant 9.99999974E-6 : f32
    %25 = vector.broadcast %cst_14 : f32 to vector<8x1xf32>
    %26 = arith.addf %22, %25 : vector<8x1xf32>
    %27 = math.rsqrt %26 : vector<8x1xf32>
    %28 = vector.broadcast %27 : vector<8x1xf32> to vector<8x32xf32>
    %29 = arith.mulf %24, %28 : vector<8x32xf32>
    %30 = vector.broadcast %7 : vector<1x32xf32> to vector<8x32xf32>
    %31 = arith.mulf %29, %30 : vector<8x32xf32>
    %32 = vector.broadcast %9 : vector<1x32xf32> to vector<8x32xf32>
    %33 = arith.addf %31, %32 : vector<8x32xf32>
    %34 = arith.truncf %33 : vector<8x32xf32> to vector<8x32xbf16>
    %c0_15 = arith.constant 0 : index
    %c0_16 = arith.constant 0 : index
    %c0_17 = arith.constant 0 : index
    %35 = vector.load %arg4[%c0_15, %c0_16, %c0_17] : memref<1x32x96xbf16, #tpu.memory_space<vmem>>, vector<1x32x96xbf16>
    %36 = vector.shape_cast %35 : vector<1x32x96xbf16> to vector<32x96xbf16>
    %cst_18 = arith.constant dense<0.000000e+00> : vector<8x96xf32>
    %37 = tpu.matmul %34, %36, %cst_18 {dimension_numbers = #tpu.dot_dimension_numbers<[1], [0], [0], [1], [0, 0, 1, 1], [], []>} : vector<8x32xbf16>, vector<32x96xbf16>, vector<8x96xf32> -> vector<8x96xf32>
    %c0_19 = arith.constant 0 : index
    %c0_20 = arith.constant 0 : index
    %c0_21 = arith.constant 0 : index
    %38 = vector.load %arg5[%c0_19, %c0_20, %c0_21] : memref<1x1x96xf32, #tpu.memory_space<vmem>>, vector<1x1x96xf32>
    %39 = vector.shape_cast %38 : vector<1x1x96xf32> to vector<1x96xf32>
    %40 = vector.broadcast %39 : vector<1x96xf32> to vector<8x96xf32>
    %41 = arith.addf %37, %40 : vector<8x96xf32>
    %42 = arith.truncf %41 : vector<8x96xf32> to vector<8x96xbf16>
    %43 = vector.shape_cast %42 : vector<8x96xbf16> to vector<1x8x96xbf16>
    %c0_22 = arith.constant 0 : index
    %c0_23 = arith.constant 0 : index
    %c0_24 = arith.constant 0 : index
    %44 = vector.load %arg17[%c0_22, %c0_23, %c0_24] : memref<1x8x96xbf16, #tpu.memory_space<vmem>>, vector<1x8x96xbf16>
    tpu.vector_store %arg17[%c0_22, %c0_23, %c0_24], %43 {strides = array<i32>} : memref<1x8x96xbf16, #tpu.memory_space<vmem>>, vector<1x8x96xbf16>,
    %cst_25 = arith.constant 0.000000e+00 : f32
    %45 = vector.broadcast %cst_25 : f32 to vector<8x32xf32>
    %c0_26 = arith.constant 0 : index
    %c0_27 = arith.constant 0 : index
    %c0_28 = arith.constant 0 : index
    %46 = vector.load %arg17[%c0_26, %c0_27, %c0_28] : memref<1x8x96xbf16, #tpu.memory_space<vmem>>, vector<1x8x8xbf16>
    %47 = vector.shape_cast %46 : vector<1x8x8xbf16> to vector<8x8xbf16>
    %c0_29 = arith.constant 0 : index
    %c0_30 = arith.constant 0 : index
    %c32 = arith.constant 32 : index
    %48 = vector.load %arg17[%c0_29, %c0_30, %c32] : memref<1x8x96xbf16, #tpu.memory_space<vmem>>, vector<1x8x8xbf16>
    %49 = vector.shape_cast %48 : vector<1x8x8xbf16> to vector<8x8xbf16>
    %c0_31 = arith.constant 0 : index
    %c0_32 = arith.constant 0 : index
    %c64 = arith.constant 64 : index
    %50 = vector.load %arg17[%c0_31, %c0_32, %c64] : memref<1x8x96xbf16, #tpu.memory_space<vmem>>, vector<1x8x8xbf16>
    %51 = vector.shape_cast %50 : vector<1x8x8xbf16> to vector<8x8xbf16>
    %cst_33 = arith.constant dense<0.000000e+00> : vector<8x8xf32>
    %52 = tpu.matmul %47, %49, %cst_33 {dimension_numbers = #tpu.dot_dimension_numbers<[1], [1], [0], [0], [0, 0, 1, 0], [], []>} : vector<8x8xbf16>, vector<8x8xbf16>, vector<8x8xf32> -> vector<8x8xf32>
    %cst_34 = arith.constant 0.353553385 : f32
    %53 = vector.broadcast %cst_34 : f32 to vector<8x8xf32>
    %54 = arith.mulf %52, %53 : vector<8x8xf32>
    %55 = arith.addf %54, %5 : vector<8x8xf32>
    %cst_35 = arith.constant dense<0xFF800000> : vector<8xf32>
    %56 = vector.multi_reduction <maximumf>, %55, %cst_35 [1] : vector<8x8xf32> to vector<8xf32>
    %57 = vector.shape_cast %56 : vector<8xf32> to vector<8x1xf32>
    %58 = vector.broadcast %57 : vector<8x1xf32> to vector<8x8xf32>
    %59 = arith.subf %55, %58 : vector<8x8xf32>
    %60 = math.exp %59 : vector<8x8xf32>
    %cst_36 = arith.constant dense<0.000000e+00> : vector<8xf32>
    %61 = vector.multi_reduction <add>, %60, %cst_36 [1] : vector<8x8xf32> to vector<8xf32>
    %62 = vector.shape_cast %61 : vector<8xf32> to vector<8x1xf32>
    %63 = tpu.reciprocal %62 {approx = true} : vector<8x1xf32> -> vector<8x1xf32>
    %64 = vector.broadcast %63 : vector<8x1xf32> to vector<8x8xf32>
    %65 = arith.mulf %60, %64 : vector<8x8xf32>
    %66 = arith.truncf %65 : vector<8x8xf32> to vector<8x8xbf16>
    %cst_37 = arith.constant dense<0.000000e+00> : vector<8x8xf32>
    %67 = tpu.matmul %66, %51, %cst_37 {dimension_numbers = #tpu.dot_dimension_numbers<[1], [0], [0], [1], [0, 0, 1, 1], [], []>} : vector<8x8xbf16>, vector<8x8xbf16>, vector<8x8xf32> -> vector<8x8xf32>
    %68 = arith.truncf %67 : vector<8x8xf32> to vector<8x8xbf16>
    %c0_38 = arith.constant 0 : index
    %c0_39 = arith.constant 0 : index
    %c0_40 = arith.constant 0 : index
    %c0_41 = arith.constant 0 : index
    %69 = vector.load %arg6[%c0_38, %c0_39, %c0_40, %c0_41] : memref<1x4x8x32xbf16, #tpu.memory_space<vmem>>, vector<1x1x8x32xbf16>
    %70 = vector.shape_cast %69 : vector<1x1x8x32xbf16> to vector<8x32xbf16>
    %cst_42 = arith.constant dense<0.000000e+00> : vector<8x32xf32>
    %71 = tpu.matmul %68, %70, %cst_42 {dimension_numbers = #tpu.dot_dimension_numbers<[1], [0], [0], [1], [0, 0, 1, 1], [], []>} : vector<8x8xbf16>, vector<8x32xbf16>, vector<8x32xf32> -> vector<8x32xf32>
    %72 = arith.addf %45, %71 : vector<8x32xf32>
    %c0_43 = arith.constant 0 : index
    %c0_44 = arith.constant 0 : index
    %c8 = arith.constant 8 : index
    %73 = vector.load %arg17[%c0_43, %c0_44, %c8] : memref<1x8x96xbf16, #tpu.memory_space<vmem>>, vector<1x8x8xbf16>
    %74 = vector.shape_cast %73 : vector<1x8x8xbf16> to vector<8x8xbf16>
    %c0_45 = arith.constant 0 : index
    %c0_46 = arith.constant 0 : index
    %c40 = arith.constant 40 : index
    %75 = vector.load %arg17[%c0_45, %c0_46, %c40] : memref<1x8x96xbf16, #tpu.memory_space<vmem>>, vector<1x8x8xbf16>
    %76 = vector.shape_cast %75 : vector<1x8x8xbf16> to vector<8x8xbf16>
    %c0_47 = arith.constant 0 : index
    %c0_48 = arith.constant 0 : index
    %c72 = arith.constant 72 : index
    %77 = vector.load %arg17[%c0_47, %c0_48, %c72] : memref<1x8x96xbf16, #tpu.memory_space<vmem>>, vector<1x8x8xbf16>
    %78 = vector.shape_cast %77 : vector<1x8x8xbf16> to vector<8x8xbf16>
    %cst_49 = arith.constant dense<0.000000e+00> : vector<8x8xf32>
    %79 = tpu.matmul %74, %76, %cst_49 {dimension_numbers = #tpu.dot_dimension_numbers<[1], [1], [0], [0], [0, 0, 1, 0], [], []>} : vector<8x8xbf16>, vector<8x8xbf16>, vector<8x8xf32> -> vector<8x8xf32>
    %cst_50 = arith.constant 0.353553385 : f32
    %80 = vector.broadcast %cst_50 : f32 to vector<8x8xf32>
    %81 = arith.mulf %79, %80 : vector<8x8xf32>
    %82 = arith.addf %81, %5 : vector<8x8xf32>
    %cst_51 = arith.constant dense<0xFF800000> : vector<8xf32>
    %83 = vector.multi_reduction <maximumf>, %82, %cst_51 [1] : vector<8x8xf32> to vector<8xf32>
    %84 = vector.shape_cast %83 : vector<8xf32> to vector<8x1xf32>
    %85 = vector.broadcast %84 : vector<8x1xf32> to vector<8x8xf32>
    %86 = arith.subf %82, %85 : vector<8x8xf32>
    %87 = math.exp %86 : vector<8x8xf32>
    %cst_52 = arith.constant dense<0.000000e+00> : vector<8xf32>
    %88 = vector.multi_reduction <add>, %87, %cst_52 [1] : vector<8x8xf32> to vector<8xf32>
    %89 = vector.shape_cast %88 : vector<8xf32> to vector<8x1xf32>
    %90 = tpu.reciprocal %89 {approx = true} : vector<8x1xf32> -> vector<8x1xf32>
    %91 = vector.broadcast %90 : vector<8x1xf32> to vector<8x8xf32>
    %92 = arith.mulf %87, %91 : vector<8x8xf32>
    %93 = arith.truncf %92 : vector<8x8xf32> to vector<8x8xbf16>
    %cst_53 = arith.constant dense<0.000000e+00> : vector<8x8xf32>
    %94 = tpu.matmul %93, %78, %cst_53 {dimension_numbers = #tpu.dot_dimension_numbers<[1], [0], [0], [1], [0, 0, 1, 1], [], []>} : vector<8x8xbf16>, vector<8x8xbf16>, vector<8x8xf32> -> vector<8x8xf32>
    %95 = arith.truncf %94 : vector<8x8xf32> to vector<8x8xbf16>
    %c0_54 = arith.constant 0 : index
    %c1 = arith.constant 1 : index
    %c0_55 = arith.constant 0 : index
    %c0_56 = arith.constant 0 : index
    %96 = vector.load %arg6[%c0_54, %c1, %c0_55, %c0_56] : memref<1x4x8x32xbf16, #tpu.memory_space<vmem>>, vector<1x1x8x32xbf16>
    %97 = vector.shape_cast %96 : vector<1x1x8x32xbf16> to vector<8x32xbf16>
    %cst_57 = arith.constant dense<0.000000e+00> : vector<8x32xf32>
    %98 = tpu.matmul %95, %97, %cst_57 {dimension_numbers = #tpu.dot_dimension_numbers<[1], [0], [0], [1], [0, 0, 1, 1], [], []>} : vector<8x8xbf16>, vector<8x32xbf16>, vector<8x32xf32> -> vector<8x32xf32>
    %99 = arith.addf %72, %98 : vector<8x32xf32>
    %c0_58 = arith.constant 0 : index
    %c0_59 = arith.constant 0 : index
    %c16 = arith.constant 16 : index
    %100 = vector.load %arg17[%c0_58, %c0_59, %c16] : memref<1x8x96xbf16, #tpu.memory_space<vmem>>, vector<1x8x8xbf16>
    %101 = vector.shape_cast %100 : vector<1x8x8xbf16> to vector<8x8xbf16>
    %c0_60 = arith.constant 0 : index
    %c0_61 = arith.constant 0 : index
    %c48 = arith.constant 48 : index
    %102 = vector.load %arg17[%c0_60, %c0_61, %c48] : memref<1x8x96xbf16, #tpu.memory_space<vmem>>, vector<1x8x8xbf16>
    %103 = vector.shape_cast %102 : vector<1x8x8xbf16> to vector<8x8xbf16>
    %c0_62 = arith.constant 0 : index
    %c0_63 = arith.constant 0 : index
    %c80 = arith.constant 80 : index
    %104 = vector.load %arg17[%c0_62, %c0_63, %c80] : memref<1x8x96xbf16, #tpu.memory_space<vmem>>, vector<1x8x8xbf16>
    %105 = vector.shape_cast %104 : vector<1x8x8xbf16> to vector<8x8xbf16>
    %cst_64 = arith.constant dense<0.000000e+00> : vector<8x8xf32>
    %106 = tpu.matmul %101, %103, %cst_64 {dimension_numbers = #tpu.dot_dimension_numbers<[1], [1], [0], [0], [0, 0, 1, 0], [], []>} : vector<8x8xbf16>, vector<8x8xbf16>, vector<8x8xf32> -> vector<8x8xf32>
    %cst_65 = arith.constant 0.353553385 : f32
    %107 = vector.broadcast %cst_65 : f32 to vector<8x8xf32>
    %108 = arith.mulf %106, %107 : vector<8x8xf32>
    %109 = arith.addf %108, %5 : vector<8x8xf32>
    %cst_66 = arith.constant dense<0xFF800000> : vector<8xf32>
    %110 = vector.multi_reduction <maximumf>, %109, %cst_66 [1] : vector<8x8xf32> to vector<8xf32>
    %111 = vector.shape_cast %110 : vector<8xf32> to vector<8x1xf32>
    %112 = vector.broadcast %111 : vector<8x1xf32> to vector<8x8xf32>
    %113 = arith.subf %109, %112 : vector<8x8xf32>
    %114 = math.exp %113 : vector<8x8xf32>
    %cst_67 = arith.constant dense<0.000000e+00> : vector<8xf32>
    %115 = vector.multi_reduction <add>, %114, %cst_67 [1] : vector<8x8xf32> to vector<8xf32>
    %116 = vector.shape_cast %115 : vector<8xf32> to vector<8x1xf32>
    %117 = tpu.reciprocal %116 {approx = true} : vector<8x1xf32> -> vector<8x1xf32>
    %118 = vector.broadcast %117 : vector<8x1xf32> to vector<8x8xf32>
    %119 = arith.mulf %114, %118 : vector<8x8xf32>
    %120 = arith.truncf %119 : vector<8x8xf32> to vector<8x8xbf16>
    %cst_68 = arith.constant dense<0.000000e+00> : vector<8x8xf32>
    %121 = tpu.matmul %120, %105, %cst_68 {dimension_numbers = #tpu.dot_dimension_numbers<[1], [0], [0], [1], [0, 0, 1, 1], [], []>} : vector<8x8xbf16>, vector<8x8xbf16>, vector<8x8xf32> -> vector<8x8xf32>
    %122 = arith.truncf %121 : vector<8x8xf32> to vector<8x8xbf16>
    %c0_69 = arith.constant 0 : index
    %c2 = arith.constant 2 : index
    %c0_70 = arith.constant 0 : index
    %c0_71 = arith.constant 0 : index
    %123 = vector.load %arg6[%c0_69, %c2, %c0_70, %c0_71] : memref<1x4x8x32xbf16, #tpu.memory_space<vmem>>, vector<1x1x8x32xbf16>
    %124 = vector.shape_cast %123 : vector<1x1x8x32xbf16> to vector<8x32xbf16>
    %cst_72 = arith.constant dense<0.000000e+00> : vector<8x32xf32>
    %125 = tpu.matmul %122, %124, %cst_72 {dimension_numbers = #tpu.dot_dimension_numbers<[1], [0], [0], [1], [0, 0, 1, 1], [], []>} : vector<8x8xbf16>, vector<8x32xbf16>, vector<8x32xf32> -> vector<8x32xf32>
    %126 = arith.addf %99, %125 : vector<8x32xf32>
    %c0_73 = arith.constant 0 : index
    %c0_74 = arith.constant 0 : index
    %c24 = arith.constant 24 : index
    %127 = vector.load %arg17[%c0_73, %c0_74, %c24] : memref<1x8x96xbf16, #tpu.memory_space<vmem>>, vector<1x8x8xbf16>
    %128 = vector.shape_cast %127 : vector<1x8x8xbf16> to vector<8x8xbf16>
    %c0_75 = arith.constant 0 : index
    %c0_76 = arith.constant 0 : index
    %c56 = arith.constant 56 : index
    %129 = vector.load %arg17[%c0_75, %c0_76, %c56] : memref<1x8x96xbf16, #tpu.memory_space<vmem>>, vector<1x8x8xbf16>
    %130 = vector.shape_cast %129 : vector<1x8x8xbf16> to vector<8x8xbf16>
    %c0_77 = arith.constant 0 : index
    %c0_78 = arith.constant 0 : index
    %c88 = arith.constant 88 : index
    %131 = vector.load %arg17[%c0_77, %c0_78, %c88] : memref<1x8x96xbf16, #tpu.memory_space<vmem>>, vector<1x8x8xbf16>
    %132 = vector.shape_cast %131 : vector<1x8x8xbf16> to vector<8x8xbf16>
    %cst_79 = arith.constant dense<0.000000e+00> : vector<8x8xf32>
    %133 = tpu.matmul %128, %130, %cst_79 {dimension_numbers = #tpu.dot_dimension_numbers<[1], [1], [0], [0], [0, 0, 1, 0], [], []>} : vector<8x8xbf16>, vector<8x8xbf16>, vector<8x8xf32> -> vector<8x8xf32>
    %cst_80 = arith.constant 0.353553385 : f32
    %134 = vector.broadcast %cst_80 : f32 to vector<8x8xf32>
    %135 = arith.mulf %133, %134 : vector<8x8xf32>
    %136 = arith.addf %135, %5 : vector<8x8xf32>
    %cst_81 = arith.constant dense<0xFF800000> : vector<8xf32>
    %137 = vector.multi_reduction <maximumf>, %136, %cst_81 [1] : vector<8x8xf32> to vector<8xf32>
    %138 = vector.shape_cast %137 : vector<8xf32> to vector<8x1xf32>
    %139 = vector.broadcast %138 : vector<8x1xf32> to vector<8x8xf32>
    %140 = arith.subf %136, %139 : vector<8x8xf32>
    %141 = math.exp %140 : vector<8x8xf32>
    %cst_82 = arith.constant dense<0.000000e+00> : vector<8xf32>
    %142 = vector.multi_reduction <add>, %141, %cst_82 [1] : vector<8x8xf32> to vector<8xf32>
    %143 = vector.shape_cast %142 : vector<8xf32> to vector<8x1xf32>
    %144 = tpu.reciprocal %143 {approx = true} : vector<8x1xf32> -> vector<8x1xf32>
    %145 = vector.broadcast %144 : vector<8x1xf32> to vector<8x8xf32>
    %146 = arith.mulf %141, %145 : vector<8x8xf32>
    %147 = arith.truncf %146 : vector<8x8xf32> to vector<8x8xbf16>
    %cst_83 = arith.constant dense<0.000000e+00> : vector<8x8xf32>
    %148 = tpu.matmul %147, %132, %cst_83 {dimension_numbers = #tpu.dot_dimension_numbers<[1], [0], [0], [1], [0, 0, 1, 1], [], []>} : vector<8x8xbf16>, vector<8x8xbf16>, vector<8x8xf32> -> vector<8x8xf32>
    %149 = arith.truncf %148 : vector<8x8xf32> to vector<8x8xbf16>
    %c0_84 = arith.constant 0 : index
    %c3 = arith.constant 3 : index
    %c0_85 = arith.constant 0 : index
    %c0_86 = arith.constant 0 : index
    %150 = vector.load %arg6[%c0_84, %c3, %c0_85, %c0_86] : memref<1x4x8x32xbf16, #tpu.memory_space<vmem>>, vector<1x1x8x32xbf16>
    %151 = vector.shape_cast %150 : vector<1x1x8x32xbf16> to vector<8x32xbf16>
    %cst_87 = arith.constant dense<0.000000e+00> : vector<8x32xf32>
    %152 = tpu.matmul %149, %151, %cst_87 {dimension_numbers = #tpu.dot_dimension_numbers<[1], [0], [0], [1], [0, 0, 1, 1], [], []>} : vector<8x8xbf16>, vector<8x32xbf16>, vector<8x32xf32> -> vector<8x32xf32>
    %153 = arith.addf %126, %152 : vector<8x32xf32>
    %154 = arith.addf %4, %153 : vector<8x32xf32>
    %c0_88 = arith.constant 0 : index
    %c0_89 = arith.constant 0 : index
    %c0_90 = arith.constant 0 : index
    %155 = vector.load %arg7[%c0_88, %c0_89, %c0_90] : memref<1x1x32xf32, #tpu.memory_space<vmem>>, vector<1x1x32xf32>
    %156 = vector.shape_cast %155 : vector<1x1x32xf32> to vector<1x32xf32>
    %157 = vector.broadcast %156 : vector<1x32xf32> to vector<8x32xf32>
    %158 = arith.addf %154, %157 : vector<8x32xf32>
    %c0_91 = arith.constant 0 : index
    %c0_92 = arith.constant 0 : index
    %c0_93 = arith.constant 0 : index
    %159 = vector.load %arg10[%c0_91, %c0_92, %c0_93] : memref<1x1x32xf32, #tpu.memory_space<vmem>>, vector<1x1x32xf32>
    %160 = vector.shape_cast %159 : vector<1x1x32xf32> to vector<1x32xf32>
    %c0_94 = arith.constant 0 : index
    %c0_95 = arith.constant 0 : index
    %c0_96 = arith.constant 0 : index
    %161 = vector.load %arg11[%c0_94, %c0_95, %c0_96] : memref<1x1x32xf32, #tpu.memory_space<vmem>>, vector<1x1x32xf32>
    %162 = vector.shape_cast %161 : vector<1x1x32xf32> to vector<1x32xf32>
    %cst_97 = arith.constant dense<0.000000e+00> : vector<8xf32>
    %163 = vector.multi_reduction <add>, %158, %cst_97 [1] : vector<8x32xf32> to vector<8xf32>
    %164 = vector.shape_cast %163 : vector<8xf32> to vector<8x1xf32>
    %cst_98 = arith.constant 3.200000e+01 : f32
    %165 = vector.broadcast %cst_98 : f32 to vector<8x1xf32>
    %166 = arith.divf %164, %165 : vector<8x1xf32>
    %167 = vector.broadcast %166 : vector<8x1xf32> to vector<8x32xf32>
    %168 = arith.subf %158, %167 : vector<8x32xf32>
    %169 = vector.broadcast %166 : vector<8x1xf32> to vector<8x32xf32>
    %170 = arith.subf %158, %169 : vector<8x32xf32>
    %171 = arith.mulf %168, %170 : vector<8x32xf32>
    %cst_99 = arith.constant dense<0.000000e+00> : vector<8xf32>
    %172 = vector.multi_reduction <add>, %171, %cst_99 [1] : vector<8x32xf32> to vector<8xf32>
    %173 = vector.shape_cast %172 : vector<8xf32> to vector<8x1xf32>
    %cst_100 = arith.constant 3.200000e+01 : f32
    %174 = vector.broadcast %cst_100 : f32 to vector<8x1xf32>
    %175 = arith.divf %173, %174 : vector<8x1xf32>
    %176 = vector.broadcast %166 : vector<8x1xf32> to vector<8x32xf32>
    %177 = arith.subf %158, %176 : vector<8x32xf32>
    %cst_101 = arith.constant 9.99999974E-6 : f32
    %178 = vector.broadcast %cst_101 : f32 to vector<8x1xf32>
    %179 = arith.addf %175, %178 : vector<8x1xf32>
    %180 = math.rsqrt %179 : vector<8x1xf32>
    %181 = vector.broadcast %180 : vector<8x1xf32> to vector<8x32xf32>
    %182 = arith.mulf %177, %181 : vector<8x32xf32>
    %183 = vector.broadcast %160 : vector<1x32xf32> to vector<8x32xf32>
    %184 = arith.mulf %182, %183 : vector<8x32xf32>
    %185 = vector.broadcast %162 : vector<1x32xf32> to vector<8x32xf32>
    %186 = arith.addf %184, %185 : vector<8x32xf32>
    %187 = arith.truncf %186 : vector<8x32xf32> to vector<8x32xbf16>
    %c0_102 = arith.constant 0 : index
    %c0_103 = arith.constant 0 : index
    %c0_104 = arith.constant 0 : index
    %188 = vector.load %arg12[%c0_102, %c0_103, %c0_104] : memref<1x32x128xbf16, #tpu.memory_space<vmem>>, vector<1x32x128xbf16>
    %189 = vector.shape_cast %188 : vector<1x32x128xbf16> to vector<32x128xbf16>
    %cst_105 = arith.constant dense<0.000000e+00> : vector<8x128xf32>
    %190 = tpu.matmul %187, %189, %cst_105 {dimension_numbers = #tpu.dot_dimension_numbers<[1], [0], [0], [1], [0, 0, 1, 1], [], []>} : vector<8x32xbf16>, vector<32x128xbf16>, vector<8x128xf32> -> vector<8x128xf32>
    %c0_106 = arith.constant 0 : index
    %c0_107 = arith.constant 0 : index
    %c0_108 = arith.constant 0 : index
    %191 = vector.load %arg13[%c0_106, %c0_107, %c0_108] : memref<1x1x128xf32, #tpu.memory_space<vmem>>, vector<1x1x128xf32>
    %192 = vector.shape_cast %191 : vector<1x1x128xf32> to vector<1x128xf32>
    %193 = vector.broadcast %192 : vector<1x128xf32> to vector<8x128xf32>
    %194 = arith.addf %190, %193 : vector<8x128xf32>
    %cst_109 = arith.constant 5.000000e-01 : f32
    %195 = vector.broadcast %cst_109 : f32 to vector<8x128xf32>
    %196 = arith.mulf %195, %194 : vector<8x128xf32>
    %cst_110 = arith.constant 0.707106769 : f32
    %197 = vector.broadcast %cst_110 : f32 to vector<8x128xf32>
    %198 = arith.mulf %194, %197 : vector<8x128xf32>
    %cst_111 = arith.constant 0.000000e+00 : f32
    %199 = vector.broadcast %cst_111 : f32 to vector<8x128xf32>
    %200 = arith.cmpf oge, %198, %199 : vector<8x128xf32>
    %cst_112 = arith.constant 1.000000e+00 : f32
    %cst_113 = arith.constant -1.000000e+00 : f32
    %201 = vector.broadcast %cst_112 : f32 to vector<8x128xf32>
    %202 = vector.broadcast %cst_113 : f32 to vector<8x128xf32>
    %203 = arith.select %200, %201, %202 : vector<8x128xi1>, vector<8x128xf32>
    %204 = math.absf %198 : vector<8x128xf32>
    %cst_114 = arith.constant 0.327591091 : f32
    %205 = vector.broadcast %cst_114 : f32 to vector<8x128xf32>
    %206 = arith.mulf %205, %204 : vector<8x128xf32>
    %cst_115 = arith.constant 1.000000e+00 : f32
    %207 = vector.broadcast %cst_115 : f32 to vector<8x128xf32>
    %208 = arith.addf %207, %206 : vector<8x128xf32>
    %cst_116 = arith.constant 1.000000e+00 : f32
    %209 = vector.broadcast %cst_116 : f32 to vector<8x128xf32>
    %210 = arith.divf %209, %208 : vector<8x128xf32>
    %cst_117 = arith.constant 1.06140542 : f32
    %211 = vector.broadcast %cst_117 : f32 to vector<8x128xf32>
    %212 = arith.mulf %211, %210 : vector<8x128xf32>
    %cst_118 = arith.constant -1.45315206 : f32
    %213 = vector.broadcast %cst_118 : f32 to vector<8x128xf32>
    %214 = arith.addf %212, %213 : vector<8x128xf32>
    %215 = arith.mulf %214, %210 : vector<8x128xf32>
    %cst_119 = arith.constant 1.42141378 : f32
    %216 = vector.broadcast %cst_119 : f32 to vector<8x128xf32>
    %217 = arith.addf %215, %216 : vector<8x128xf32>
    %218 = arith.mulf %217, %210 : vector<8x128xf32>
    %cst_120 = arith.constant -0.284496725 : f32
    %219 = vector.broadcast %cst_120 : f32 to vector<8x128xf32>
    %220 = arith.addf %218, %219 : vector<8x128xf32>
    %221 = arith.mulf %220, %210 : vector<8x128xf32>
    %cst_121 = arith.constant 0.254829586 : f32
    %222 = vector.broadcast %cst_121 : f32 to vector<8x128xf32>
    %223 = arith.addf %221, %222 : vector<8x128xf32>
    %224 = arith.mulf %223, %210 : vector<8x128xf32>
    %cst_122 = arith.constant 0.000000e+00 : f32
    %225 = vector.broadcast %cst_122 : f32 to vector<8x128xf32>
    %226 = arith.subf %225, %204 : vector<8x128xf32>
    %227 = arith.mulf %226, %204 : vector<8x128xf32>
    %228 = math.exp %227 : vector<8x128xf32>
    %229 = arith.mulf %224, %228 : vector<8x128xf32>
    %cst_123 = arith.constant 1.000000e+00 : f32
    %230 = vector.broadcast %cst_123 : f32 to vector<8x128xf32>
    %231 = arith.subf %230, %229 : vector<8x128xf32>
    %232 = arith.mulf %203, %231 : vector<8x128xf32>
    %cst_124 = arith.constant 1.000000e+00 : f32
    %233 = vector.broadcast %cst_124 : f32 to vector<8x128xf32>
    %234 = arith.addf %233, %232 : vector<8x128xf32>
    %235 = arith.mulf %196, %234 : vector<8x128xf32>
    %236 = arith.truncf %235 : vector<8x128xf32> to vector<8x128xbf16>
    %c0_125 = arith.constant 0 : index
    %c0_126 = arith.constant 0 : index
    %c0_127 = arith.constant 0 : index
    %237 = vector.load %arg14[%c0_125, %c0_126, %c0_127] : memref<1x128x32xbf16, #tpu.memory_space<vmem>>, vector<1x128x32xbf16>
    %238 = vector.shape_cast %237 : vector<1x128x32xbf16> to vector<128x32xbf16>
    %cst_128 = arith.constant dense<0.000000e+00> : vector<8x32xf32>
    %239 = tpu.matmul %236, %238, %cst_128 {dimension_numbers = #tpu.dot_dimension_numbers<[1], [0], [0], [1], [0, 0, 1, 1], [], []>} : vector<8x128xbf16>, vector<128x32xbf16>, vector<8x32xf32> -> vector<8x32xf32>
    %c0_129 = arith.constant 0 : index
    %c0_130 = arith.constant 0 : index
    %c0_131 = arith.constant 0 : index
    %240 = vector.load %arg15[%c0_129, %c0_130, %c0_131] : memref<1x1x32xf32, #tpu.memory_space<vmem>>, vector<1x1x32xf32>
    %241 = vector.shape_cast %240 : vector<1x1x32xf32> to vector<1x32xf32>
    %242 = vector.broadcast %241 : vector<1x32xf32> to vector<8x32xf32>
    %243 = arith.addf %239, %242 : vector<8x32xf32>
    %244 = arith.addf %158, %243 : vector<8x32xf32>
    %245 = vector.shape_cast %244 : vector<8x32xf32> to vector<1x8x32xf32>
    %c0_132 = arith.constant 0 : index
    %c0_133 = arith.constant 0 : index
    %c0_134 = arith.constant 0 : index
    %246 = vector.load %arg16[%c0_132, %c0_133, %c0_134] : memref<1x8x32xf32, #tpu.memory_space<vmem>>, vector<1x8x32xf32>
    tpu.vector_store %arg16[%c0_132, %c0_133, %c0_134], %245 {strides = array<i32>} : memref<1x8x32xf32, #tpu.memory_space<vmem>>, vector<1x8x32xf32>,
    return
  }
  func.func @transform_0(%arg0: i32, %arg1: i32) -> (i32, i32) {
    %c0_i32 = arith.constant 0 : i32
    %c0_i32_0 = arith.constant 0 : i32
    %c0_i32_1 = arith.constant 0 : i32
    return %c0_i32, %c0_i32_0 : i32, i32
  }
  func.func @transform_1(%arg0: i32, %arg1: i32) -> (i32, i32, i32) {
    %c0_i32 = arith.constant 0 : i32
    %c0_i32_0 = arith.constant 0 : i32
    %c0_i32_1 = arith.constant 0 : i32
    return %arg0, %c0_i32, %c0_i32_0 : i32, i32, i32
  }
  func.func @transform_2(%arg0: i32, %arg1: i32) -> (i32, i32, i32) {
    %c0_i32 = arith.constant 0 : i32
    %c0_i32_0 = arith.constant 0 : i32
    %c0_i32_1 = arith.constant 0 : i32
    return %arg1, %c0_i32, %c0_i32_0 : i32, i32, i32
  }
  func.func @transform_3(%arg0: i32, %arg1: i32) -> (i32, i32, i32) {
    %c0_i32 = arith.constant 0 : i32
    %c0_i32_0 = arith.constant 0 : i32
    %c0_i32_1 = arith.constant 0 : i32
    return %arg1, %c0_i32, %c0_i32_0 : i32, i32, i32
  }
  func.func @transform_4(%arg0: i32, %arg1: i32) -> (i32, i32, i32, i32) {
    %c0_i32 = arith.constant 0 : i32
    %c0_i32_0 = arith.constant 0 : i32
    %c0_i32_1 = arith.constant 0 : i32
    %c0_i32_2 = arith.constant 0 : i32
    return %arg1, %c0_i32, %c0_i32_0, %c0_i32_1 : i32, i32, i32, i32
  }
  func.func @transform_5(%arg0: i32, %arg1: i32) -> (i32, i32, i32) {
    %c0_i32 = arith.constant 0 : i32
    %c0_i32_0 = arith.constant 0 : i32
    %c0_i32_1 = arith.constant 0 : i32
    return %arg1, %c0_i32, %c0_i32_0 : i32, i32, i32
  }
  func.func @transform_6(%arg0: i32, %arg1: i32) -> (i32, i32, i32) {
    %c0_i32 = arith.constant 0 : i32
    %c0_i32_0 = arith.constant 0 : i32
    %c0_i32_1 = arith.constant 0 : i32
    return %arg1, %c0_i32, %c0_i32_0 : i32, i32, i32
  }
  func.func @transform_7(%arg0: i32, %arg1: i32) -> (i32, i32, i32) {
    %c0_i32 = arith.constant 0 : i32
    %c0_i32_0 = arith.constant 0 : i32
    %c0_i32_1 = arith.constant 0 : i32
    return %arg1, %c0_i32, %c0_i32_0 : i32, i32, i32
  }
  func.func @transform_8(%arg0: i32, %arg1: i32) -> (i32, i32, i32) {
    %c0_i32 = arith.constant 0 : i32
    %c0_i32_0 = arith.constant 0 : i32
    %c0_i32_1 = arith.constant 0 : i32
    return %arg1, %c0_i32, %c0_i32_0 : i32, i32, i32
  }
  func.func @transform_9(%arg0: i32, %arg1: i32) -> (i32, i32, i32) {
    %c0_i32 = arith.constant 0 : i32
    %c0_i32_0 = arith.constant 0 : i32
    %c0_i32_1 = arith.constant 0 : i32
    return %arg1, %c0_i32, %c0_i32_0 : i32, i32, i32
  }
  func.func @transform_10(%arg0: i32, %arg1: i32) -> (i32, i32, i32) {
    %c0_i32 = arith.constant 0 : i32
    %c0_i32_0 = arith.constant 0 : i32
    %c0_i32_1 = arith.constant 0 : i32
    return %arg1, %c0_i32, %c0_i32_0 : i32, i32, i32
  }
  func.func @transform_11(%arg0: i32, %arg1: i32) -> (i32, i32, i32) {
    %c0_i32 = arith.constant 0 : i32
    %c0_i32_0 = arith.constant 0 : i32
    %c0_i32_1 = arith.constant 0 : i32
    return %arg1, %c0_i32, %c0_i32_0 : i32, i32, i32
  }
  func.func @transform_12(%arg0: i32, %arg1: i32) -> (i32, i32, i32) {
    %c0_i32 = arith.constant 0 : i32
    %c0_i32_0 = arith.constant 0 : i32
    %c0_i32_1 = arith.constant 0 : i32
    return %arg1, %c0_i32, %c0_i32_0 : i32, i32, i32
  }
  func.func @transform_13(%arg0: i32, %arg1: i32) -> (i32, i32, i32) {
    %c0_i32 = arith.constant 0 : i32
    %c0_i32_0 = arith.constant 0 : i32
    %c0_i32_1 = arith.constant 0 : i32
    return %arg1, %c0_i32, %c0_i32_0 : i32, i32, i32
  }
  func.func @transform_14(%arg0: i32, %arg1: i32) -> (i32, i32, i32) {
    %c0_i32 = arith.constant 0 : i32
    %c0_i32_0 = arith.constant 0 : i32
    %c0_i32_1 = arith.constant 0 : i32
    return %arg0, %c0_i32, %c0_i32_0 : i32, i32, i32
  }
}

</mosaic_0001>

<bundles_post_ra>
// kernel: tpu_custom_call.1
= control target key start
LH: loop header
LB: loop body
LE: loop exit
PB: predicated region body
PF: predicated region fallthrough
CT: control target
= control target key end

     0   :  { %s2212_s0 = inlined_call_operand.vmem [shape: f32[8,8], index: 0, kind: input, shape index: {}]   ;;  %s2213_s1 = inlined_call_operand.vmem [shape: f32[2,8,32], index: 1, kind: input, shape index: {}]   ;;  %s2214_s2 = inlined_call_operand.vmem [shape: bf16[2,32,96], index: 2, kind: input, shape index: {}]   ;;  %s2215_s3 = inlined_call_operand.vmem [shape: f32[2,1,96], index: 3, kind: input, shape index: {}]   ;;  %s2216_s4 = inlined_call_operand.vmem [shape: bf16[2,4,8,32], index: 4, kind: input, shape index: {}]   ;;  %s2217_s5 = inlined_call_operand.vmem [shape: f32[2,1,32], index: 5, kind: input, shape index: {}]   ;;  %s2218_s6 = inlined_call_operand.vmem [shape: f32[2,1,32], index: 6, kind: input, shape index: {}]   ;;  %s2219_s7 = inlined_call_operand.vmem [shape: f32[2,1,32], index: 7, kind: input, shape index: {}]   ;;  %s2220_s8 = inlined_call_operand.vmem [shape: f32[2,1,32], index: 8, kind: input, shape index: {}]   ;;  %s2221_s9 = inlined_call_operand.vmem [shape: f32[2,1,32], index: 9, kind: input, shape index: {}]   ;;  %s2222_s10 = inlined_call_operand.vmem [shape: bf16[2,32,128], index: 10, kind: input, shape index: {}]   ;;  %s2223_s11 = inlined_call_operand.vmem [shape: f32[2,1,128], index: 11, kind: input, shape index: {}]   ;;  %s2224_s12 = inlined_call_operand.vmem [shape: bf16[2,128,32], index: 12, kind: input, shape index: {}]   ;;  %s2225_s13 = inlined_call_operand.vmem [shape: f32[2,1,32], index: 13, kind: input, shape index: {}]   ;;  %s2226_s14 = inlined_call_operand.hbm [shape: f32[2,8,32], index: 14, kind: output, shape index: {}]  }
   0x1   :  { %2244 = sst [smem:[#allocation21_spill]] %s2212_s0 }
   0x2   :  { %2245 = sst [smem:[#allocation22_spill]] %s2213_s1 }
   0x3   :  { %2246 = sst [smem:[#allocation23_spill]] %s2214_s2 }
   0x4   :  { %2247 = sst [smem:[#allocation24_spill]] %s2216_s4 }
   0x5   :  { %2248 = sst [smem:[#allocation25_spill]] %s2226_s14 }
   0x6   :  { %19 = vsyncpa [#allocation4], 0 }
   0x7   :  { %21 = vsyncpa [#allocation4 + $0x1], 0  ;;  %s1890_s29 = smov 0   ;;  %s1892_s30 = smov 0  }
   0x8   :  { %s1894_s15 = smov 0   ;;  %s1896_s16 = smov 0  }
   0x9   :  { %s1898_s17 = smov 0   ;;  %s1900_s18 = smov 0  }
   0xa   :  { %s1902_s19 = smov 0   ;;  %s1904_s20 = smov 0  }
   0xb LB: > { %2249 = sst [smem:[#allocation6_spill]] %s1772_s29  ;;  %s1487_s21 = sadd.s32 4294967295, %s1800_s20   ;;  %s1800_s20 = sphi %s1904_s20, %s27_s20   ;;  %s1796_s19 = sphi %s1902_s19, %s2291_s19   ;;  %s1792_s18 = sphi %s1900_s18, %s2290_s18   ;;  %s1788_s17 = sphi %s1898_s17, %s2289_s17   ;;  %s1784_s16 = sphi %s1896_s16, %s2288_s16   ;;  %s1780_s15 = sphi %s1894_s15, %s2287_s15   ;;  %s1776_s30 = sphi %s1892_s30, %s2286_s30   ;;  %s1772_s29 = sphi %s1890_s29, %s2285_s29  }
   0xc   : > { %2250 = sst [smem:[#allocation7_spill]] %s1776_s30  ;;  %s1488_s22 = sadd.s32 4294967294, %s1800_s20  }
   0xd   : > { %2251 = sst [smem:[#allocation8_spill]] %s1780_s15  ;;  %s36_s23 = sadd.s32 1, %s1792_s18 }
   0xe   : > { %2252 = sst [smem:[#allocation9_spill]] %s1784_s16  ;;  %p37_p0 = scmp.ge.s32.totalorder %s36_s23, 2 }
   0xf   : > { %2253 = sst [smem:[#allocation10_spill]] %s1788_s17  ;;  %s39_s24 = sadd.s32 1, %s1796_s19 }
  0x10   : > { %2254 = sst [smem:[#allocation11_spill]] %s1792_s18  ;;  %p415_p1 = scmp.ne.s32.totalorder %s1780_s15, %s1776_s30 }
  0x11   : > { %2255 = sst [smem:[#allocation12_spill]] %s1796_s19  ;;  %p416_p2 = scmp.eq.s32.totalorder %s1487_s21, 3 }
  0x12   : > { %2256 = sst [smem:[#allocation13_spill]] %s1800_s20  ;;  %s2293_s23 = smov (%p37_p0, %s36_s23), 0 }
  0x13   : > { %2257 = sst [smem:[#allocation14_spill]] %s2293_s23  ;;  %s2295_s24 = smov (!%p37_p0, %s39_s24), %s1796_s19 }
  0x14   : > { %p1939_p3 = por %p416_p2, %p415_p1  ;;  %p421_p4 = scmp.ne.s32.totalorder %s1776_s30, %s1772_s29 }
  0x15   : > { %p41_p5 = scmp.ge.s32.totalorder %s2295_s24, 2  ;;  %p422_p6 = scmp.eq.s32.totalorder %s1488_s22, 3 }
  0x16   : > { %s2258_s25 = scalar_select %p1939_p3, 1, 0 }
  0x17   : > { %p1491_p7 = scmp.ge.s32.totalorder %s1800_s20, 1  ;;  %p530_p8 = scmp.lt.s32.totalorder %s1800_s20, 5 }
  0x18   : > { %2259 = sst [smem:[#allocation15_spill]] %s2258_s25  ;;  %s2297_s24 = smov (%p41_p5, %s2295_s24), 0 }
  0x19   : > { %2260 = sst [smem:[#allocation16_spill]] %s2297_s24  ;;  %p1949_p9 = por %p422_p6, %p421_p4 }
  0x1a   : > { %p531_p10 = pnand %p1491_p7, %p530_p8  ;;  %s402_s27 = ssub.s32 %s1796_s19, %s2297_s24 }
  0x1b   : > { %s2261_s26 = scalar_select %p1949_p9, 1, 0 }
  0x1c   : > { %s405_s28 = sadd.s32 1, %s1780_s15  ;;  %p403_p11 = scmp.eq.s32.totalorder %s402_s27, 0 }
  0x1d   : > { %2262 = sst [smem:[#allocation17_spill]] %s2261_s26  ;;  %534 = sbr.rel (%p531_p10) target bundleno = 2388 (0x954), region = 76 }
  0x1e   : > { %s1957_s21 = scalar_select %p403_p11, %s1780_s15, %s405_s28  }
  0x20   : > { %2263 = sst [smem:[#allocation18_spill]] %s1957_s21 }
  0x22   : > { %s2231_s22 = sand.u32 1, %s1776_s30   ;;  %p619_p12 = scmp.lt.s32.totalorder %s1788_s17, 1 }
  0x23   : > { %s1492_s23 = sshll.u32 %s2231_s22, 3  ;;  %p623_p13 = scmp.lt.s32.totalorder %s1784_s16, 1 }
  0x24   : > { %s620_s18 = scalar_select %p619_p12, %s1788_s17, 1 }
  0x25   : > { %s1966_s26 = scalar_select %p623_p13, %s1784_s16, 1 }
  0x26   : > { %s1493_s27 = sshll.u32 %s620_s18, 3  ;;  %s2264_s1 = sld [smem:[#allocation22_spill]] }
  0x27   : > { %s1572_s22 = sshll.u32 %s1966_s26, 4  ;;  %s2265_s2 = sld [smem:[#allocation23_spill]] }
  0x28   : > { %s2267_s4 = sld [smem:[#allocation24_spill]]  ;;  %s650_s17 = scalar_lea.vmem %s2221_s9, %s1966_s26 }
  0x29   : > { %s2009_s16 = scalar_lea.vmem %s2222_s10, %s1572_s22  ;;  %s658_s28 = scalar_lea.vmem %s2223_s11, %s1966_s26 }
  0x2a   : > { %s1575_s24 = sshll.u32 %s1966_s26, 6  ;;  %s2025_s25 = scalar_lea.vmem [#allocation3], %s1492_s23 }
  0x2b   : > { %s2023_s20 = scalar_lea.vmem %s2224_s12, %s1575_s24  ;;  %s2269_s30 = sld [smem:[#allocation9_spill]] }
  0x2c   : > { %s622_s19 = scalar_lea.vmem %s2264_s1, %s1493_s27  ;;  %s641_s1 = scalar_lea.vmem %s2218_s6, %s1966_s26 }
  0x2d   : > { %s1975_s29 = scalar_lea.vmem %s2265_s2, %s1572_s22  ;;  %s666_s2 = scalar_lea.vmem %s2225_s13, %s1966_s26 }
  0x2e   : > { %2266 = sst [smem:[#allocation19_spill]] %s1975_s29  ;;  %s1984_s0 = scalar_lea.vmem %s2267_s4, %s1572_s22 }
  0x2f   : > { %2268 = sst [smem:[#allocation20_spill]] %s1984_s0 }
  0x31   : > { %p1502_p0 = scmp.ne.s32.totalorder %s2269_s30, 0 }
  0x33   : > { %671 = sbr.rel (%p1502_p0) target bundleno = 58 (0x3a), region = 80 }
  0x38   : > { %v672_v0 = vld [vmem:[%s622_s19] sm:$0xff]  ;;  %vm673_vm0 = vcmask 261120  }
  0x39   : > { %674 = vst.msk [vmem:[%s2025_s25] sm:$0xff] %vm673_vm0, %v672_v0 }
  0x3a PF: > { %vm679_vm1 = vcmask 261120   ;;  %s2270_s0 = sld [smem:[#allocation19_spill]]  ;;  %v1802_v3 = vmov 32.0   ;;  %v1672_v26 = vld [vmem:[%s641_s1] ss:$0 sm:$0xff]  ;;  %s2271_s24 = scalar_lea.vmem %s2219_s7, %s1966_s26  ;;  %vm755_vm6 = vcmask 781312  }
  0x3b   : > { %1680 = vrcp.f32 %v1802_v3  ;;  %v1673_v29 = vld [vmem:[%s2271_s24] ss:$0 sm:$0xff]  ;;  %s2272_s15 = scalar_lea.vmem %s2215_s3, %s1966_s26  ;;  %s1803_s1 = smov 88   ;;  %vm763_vm7 = vcmask 64512   ;;  %vm802_vm8 = vcmask 1043456  }
  0x3c   : > { %v1674_v33 = vld [vmem:[%s2272_s15] ss:$0 sm:$0xff]  ;;  %s1804_s21 = smov 96   ;;  %s1805_s29 = smov 80  }
  0x3d   : > { %s1806_s14 = smov 112   ;;  %s2273_s4 = sld [smem:[#allocation21_spill]] }
  0x3e   : > { %s2274_s19 = sld [smem:[#allocation20_spill]]  ;;  %s1807_s23 = smov 64  }
  0x3f   : > { %s1808_s22 = smov 120   ;;  %s1809_s24 = smov 72  }
  0x40   : > { %v2030_v1 = vld [vmem:[%s2025_s25] sm:$0xff]  ;;  %s1810_s18 = smov 104   ;;  %s1811_s27 = smov 40  }
  0x41   : > { %v680_v2 = vsel %vm679_vm1, %v2030_v1, 0.0  ;;  %v1681_v4 = vpop.eup %1680  ;;  %v1577_v15 = vld [vmem:[%s2270_s0 + $0x8] sm:$0xff]  ;;  %v1576_v16 = vld [vmem:[%s2270_s0] sm:$0xff]  ;;  %s1812_s15 = smov 56   ;;  %s2276_s0 = scalar_lea.vmem %s2220_s8, %s1966_s26 }
  0x42   : > { %681 = vadd.xlane.f32.xlu0 %v680_v2  ;;  %v684_v5 = vmul.f32 32.0, %v1681_v4  ;;  %vm688_vm2 = vweird.f32 %v1681_v4  ;;  %747 = vmatpush.bf16.msra.mxu0 %v1577_v15 }
  0x43   : > { %v2071_v48 = vld [vmem:[%s2273_s4] sm:$0xff] }
  0x44   : > { %v685_v6 = vsub.f32 1.0, %v684_v5  ;;  %v820_v58 = vld [vmem:[%s2274_s19] sm:$0xf] }
  0x45   : > { %v905_v59 = vsel %vm802_vm8, %v820_v58, 0  ;;  %v1516_v58 = vld [vmem:[%s2274_s19 + $0x4] sm:$0xf] }
  0x46   : > { %v686_v7 = vmul.f32 %v1681_v4, %v685_v6  ;;  %748 = vmatpush.bf16.msra.mxu0 %v1576_v16  ;;  %914 = vmatpush.bf16.msra.mxu1 %v905_v59  ;;  %v886_v59 = vsel %vm802_vm8, %v1516_v58, 0 }
  0x48   : > { %v687_v8 = vadd.f32 %v1681_v4, %v686_v7 }
  0x4a   : > { %v2034_v9 = vsel %vm688_vm2, %v1681_v4, %v687_v8  ;;  %895 = vmatpush.bf16.msrb.mxu0 %v886_v59 }
  0xb5   : > { %v682_v10 = vpop.xlane.xlu0 %681 }
  0xb6   : > { %v690_v11 = vmul.f32 %v2034_v9, %v682_v10 }
  0xb8   : > { %v691_v12 = vsub.f32 %v2030_v1, %v690_v11 }
  0xba   : > { %v692_v13 = vmul.f32 %v691_v12, %v691_v12 }
  0xbc   : > { %v693_v14 = vsel %vm679_vm1, %v692_v13, 0.0 }
  0xbd   : > { %694 = vadd.xlane.f32.xlu0 %v693_v14 }
 0x130   : > { %v695_v17 = vpop.xlane.xlu0 %694 }
 0x131   : > { %v696_v18 = vmul.f32 %v695_v17, %v2034_v9 }
 0x133   : > { %v697_v19 = vadd.f32 1e-05, %v696_v18 }
 0x135   : > { %1682 = vrsqrt.f32 %v697_v19  ;;  %vm704_vm4 = vweird.f32 %v697_v19 }
 0x13b   : > { %v1683_v20 = vpop.eup %1682 }
 0x13c   : > { %v699_v21 = vmul.f32 %v1683_v20, %v697_v19  ;;  %vm705_vm3 = vweird.f32 %v1683_v20 }
 0x13d   : > { %vm706_vm5 = vmor %vm704_vm4, %vm705_vm3 }
 0x13e   : > { %v700_v22 = vmul.f32 %v1683_v20, %v699_v21 }
 0x140   : > { %v701_v23 = vmul.f32 0.5, %v700_v22 }
 0x142   : > { %v702_v24 = vsub.f32 1.5, %v701_v23 }
 0x144   : > { %v703_v25 = vmul.f32 %v1683_v20, %v702_v24 }
 0x146   : > { %v707_v27 = vsel %vm706_vm5, %v1683_v20, %v703_v25 }
 0x147   : > { %v708_v28 = vmul.f32 %v707_v27, %v691_v12 }
 0x149   : > { %v712_v30 = vmul.f32 %v1672_v26, %v708_v28 }
 0x14b   : > { %v716_v31 = vadd.f32 %v1673_v29, %v712_v30 }
 0x14d   : > { %v717_v32 = vpack.c.bf16 %v716_v31, %v716_v31 }
 0x14f   : > { %1511 = vmatmul.msk.bf16.vlgmr.msra.gmra.mxu0 %vm679_vm1, %v717_v32 }
 0x1cc   : > { %v750_v34 = vpop.f32.mrf.mxu0 }
 0x1cd   : > { %v751_v35 = vadd.f32 %v1674_v33, %v750_v34 }
 0x1cf   : > { %v754_v36 = vpack.c.bf16 %v751_v35, %v751_v35 }
 0x1d1   : > { %756 = vst.msk [vmem:[#allocation2] sm:$0xf] %vm755_vm6, %v754_v36 }
 0x1d4   : > { %v752_v37 = vpop.f32.mrf.mxu0 }
 0x1d8   : > { %v757_v38 = vld [vmem:[#allocation2] sm:$0xf] }
 0x1d9   : > { %v759_v39 = vunpack.c.l.b16 %v757_v38 }
 0x1db   : > { %v2058_v40 = vpack.c.b16 %v759_v39, %v759_v39 }
 0x1dd   : > { %823 = vrot.lane.b32.xlu0 %v2058_v40, %s1803_s1  ;;  %761 = vrot.lane.b32.xlu1 %v2058_v40, %s1804_s21  ;;  %s1813_s1 = smov 48   ;;  %s2280_s21 = sld [smem:[#allocation25_spill]] }
 0x1e5   : > { %922 = vrot.lane.b32.xlu0 %v2058_v40, %s1805_s29 }
 0x1ed   : > { %920 = vrot.lane.b32.xlu0 %v2058_v40, %s1806_s14  ;;  %s2275_s14 = scalar_lea.vmem %s2217_s5, %s1966_s26 }
 0x24f   : > { %v824_v41 = vpop.permute.xlu0 %823  ;;  %v762_v42 = vpop.permute.xlu1 %761 }
 0x250   : > { %v768_v43 = vsel %vm763_vm7, %v762_v42, 0  ;;  %v829_v44 = vsel %vm763_vm7, %v824_v41, 0 }
 0x251   : > { %777 = vmatpush.bf16.xpose.msra.mxu3 %v768_v43 }
 0x257   : > { %v923_v45 = vpop.permute.xlu0 %922 }
 0x258   : > { %v928_v46 = vsel %vm763_vm7, %v923_v45, 0  ;;  %1512 = vmatmul.msk.bf16.vlgmr.msra.gmra.mxu3 %vm763_vm7, %v757_v38 }
 0x259   : > { %838 = vmatpush.bf16.xpose.msrb.mxu3 %v829_v44 }
 0x25f   : > { %v921_v6 = vpop.permute.xlu0 %920 }
 0x261   : > { %937 = vmatpush.bf16.xpose.msra.mxu3 %v928_v46 }
 0x2db   : > { %v779_v47 = vpop.f32.mrf.mxu3 }
 0x2dc   : > { %v783_v49 = vmul.f32 0.35355338, %v779_v47 }
 0x2de   : > { %v784_v50 = vadd.f32 %v783_v49, %v2071_v48 }
 0x2e0   : > { %v785_v51 = vsel %vm763_vm7, %v784_v50, -inf }
 0x2e1   : > { %786 = vmax.xlane.f32.xlu1 %v785_v51 }
 0x2e3   : > { %v781_v52 = vpop.f32.mrf.mxu3 }
 0x354   : > { %v787_v53 = vpop.xlane.xlu1 %786 }
 0x355   : > { %v788_v54 = vsub.f32 %v784_v50, %v787_v53 }
 0x357   : > { %v789_v55 = vmul.f32 1.442695, %v788_v54 }
 0x359   : > { %1684 = vpow2.f32 %v789_v55 }
 0x35f   : > { %v1685_v56 = vpop.eup %1684 }
 0x360   : > { %v791_v57 = vsel %vm763_vm7, %v1685_v56, 0.0 }
 0x361   : > { %792 = vadd.xlane.f32.xlu2 %v791_v57 }
 0x379   : > { %797 = vrot.lane.b32.xlu2 %v2058_v40, %s1807_s23  ;;  %s1726_s23 = scalar_lea.hbm %s2280_s21, 16 }
 0x381   : > { %821 = vrot.lane.b32.xlu2 %v2058_v40, %s1808_s22 }
 0x389   : > { %1003 = vrot.lane.b32.xlu2 %v2058_v40, %s1809_s24 }
 0x391   : > { %1001 = vrot.lane.b32.xlu2 %v2058_v40, %s1810_s18 }
 0x3d4   : > { %v793_v60 = vpop.xlane.xlu2 %792 }
 0x3d5   : > { %1686 = vrcp.f32 %v793_v60 }
 0x3db   : > { %v1687_v61 = vpop.eup %1686 }
 0x3dc   : > { %v798_v62 = vpop.permute.xlu2 %797  ;;  %v795_v63 = vmul.f32 %v1687_v61, %v1685_v56  ;;  %v1521_v61 = vld [vmem:[%s2274_s19 + $0x8] sm:$0xf] }
 0x3dd   : > { %v804_v0 = vsel %vm802_vm8, %v798_v62, 0  ;;  %v985_v62 = vsel %vm802_vm8, %v1521_v61, 0  ;;  %v1583_v61 = vld [vmem:[%s2023_s20 + $0x18] sm:$0xff] }
 0x3de   : > { %813 = vmatpush.bf16.msra.mxu2 %v804_v0  ;;  %v796_v2 = vpack.c.bf16 %v795_v63, %v795_v63  ;;  %994 = vmatpush.bf16.msra.mxu0 %v985_v62  ;;  %v1582_v62 = vld [vmem:[%s2023_s20 + $0x10] sm:$0xff] }
 0x3e1   : > { %1513 = vmatmul.msk.bf16.vlgmr.msra.gmra.mxu2 %vm763_vm7, %v796_v2 }
 0x3e4   : > { %v822_v3 = vpop.permute.xlu2 %821 }
 0x3e5   : > { %1514 = vmatmul.msk.bf16.vlgmr.msrb.gmra.mxu3 %vm763_vm7, %v822_v3  ;;  %v1525_v3 = vld [vmem:[%s2274_s19 + $0xc] sm:$0xf] }
 0x3ec   : > { %v1004_v4 = vpop.permute.xlu2 %1003 }
 0x3ed   : > { %v1009_v5 = vsel %vm763_vm7, %v1004_v4, 0  ;;  %v1066_v4 = vsel %vm802_vm8, %v1525_v3, 0 }
 0x3ee   : > { %1018 = vmatpush.bf16.xpose.msrb.mxu1 %v1009_v5 }
 0x3f4   : > { %v1002_v16 = vpop.permute.xlu2 %1001 }
 0x3f5   : > { %1519 = vmatmul.msk.bf16.vlgmr.msra.gmra.mxu3 %vm763_vm7, %v921_v6 }
 0x464   : > { %v815_v7 = vpop.f32.mrf.mxu2 }
 0x465   : > { %v819_v8 = vpack.c.bf16 %v815_v7, %v815_v7 }
 0x467   : > { %1518 = vmatmul.msk.bf16.vlgmr.msra.gmra.mxu1 %vm763_vm7, %v819_v8 }
 0x468   : > { %v840_v10 = vpop.f32.mrf.mxu3 }
 0x469   : > { %v844_v11 = vmul.f32 0.35355338, %v840_v10 }
 0x46b   : > { %v845_v12 = vadd.f32 %v844_v11, %v2071_v48 }
 0x46c   : > { %v817_v13 = vpop.f32.mrf.mxu2 }
 0x46d   : > { %v846_v14 = vsel %vm763_vm7, %v845_v12, -inf }
 0x46e   : > { %847 = vmax.xlane.f32.xlu1 %v846_v14 }
 0x470   : > { %v842_v15 = vpop.f32.mrf.mxu3 }
 0x477   : > { %1523 = vmatmul.msk.bf16.vlgmr.msrb.gmra.mxu1 %vm763_vm7, %v1002_v16 }
 0x478   : > { %v939_v17 = vpop.f32.mrf.mxu3 }
 0x479   : > { %v943_v18 = vmul.f32 0.35355338, %v939_v17 }
 0x47b   : > { %v944_v19 = vadd.f32 %v943_v18, %v2071_v48 }
 0x47d   : > { %v945_v20 = vsel %vm763_vm7, %v944_v19, -inf }
 0x47e   : > { %946 = vmax.xlane.f32.xlu2 %v945_v20 }
 0x480   : > { %v941_v21 = vpop.f32.mrf.mxu3 }
 0x496   : > { %1038 = vrot.lane.b32.xlu2 %v2058_v40, %s1811_s27 }
 0x4e1   : > { %v848_v22 = vpop.xlane.xlu1 %847 }
 0x4e2   : > { %v849_v23 = vsub.f32 %v845_v12, %v848_v22 }
 0x4e4   : > { %v850_v24 = vmul.f32 1.442695, %v849_v23  ;;  %v2094_v25 = vpop.f32.mrf.mxu1  ;;  %v1675_v23 = vld [vmem:[%s2275_s14] ss:$0 sm:$0xff]  ;;  %s1294_s14 = sshll.u32 %s2025_s25, 4  ;;  %s1295_s14 = int_to_ptr.vmem [resolvable:$true] %s1294_s14 }
 0x4e6   : > { %1688 = vpow2.f32 %v850_v24 }
 0x4ec   : > { %v1689_v26 = vpop.eup %1688  ;;  %v918_v27 = vpop.f32.mrf.mxu1 }
 0x4ed   : > { %v852_v28 = vsel %vm763_vm7, %v1689_v26, 0.0 }
 0x4ee   : > { %853 = vadd.xlane.f32.xlu1 %v852_v28 }
 0x4f1   : > { %v947_v29 = vpop.xlane.xlu2 %946 }
 0x4f2   : > { %v948_v30 = vsub.f32 %v944_v19, %v947_v29 }
 0x4f4   : > { %v949_v31 = vmul.f32 1.442695, %v948_v30  ;;  %v1020_v32 = vpop.f32.mrf.mxu1 }
 0x4f5   : > { %v1024_v33 = vmul.f32 0.35355338, %v1020_v32 }
 0x4f6   : > { %1690 = vpow2.f32 %v949_v31 }
 0x4f7   : > { %v1025_v34 = vadd.f32 %v1024_v33, %v2071_v48  ;;  %v1579_v33 = vld [vmem:[%s2009_s16 + $0x8] sm:$0xff] }
 0x4f9   : > { %v1039_v35 = vpop.permute.xlu2 %1038  ;;  %v1026_v36 = vsel %vm763_vm7, %v1025_v34, -inf }
 0x4fa   : > { %v1044_v37 = vsel %vm802_vm8, %v1039_v35, 0  ;;  %1027 = vmax.xlane.f32.xlu0 %v1026_v36 }
 0x4fb   : > { %1053 = vmatpush.bf16.msrb.mxu3 %v1044_v37 }
 0x4fc   : > { %v1022_v38 = vpop.f32.mrf.mxu1  ;;  %v1691_v39 = vpop.eup %1690 }
 0x4fd   : > { %v951_v41 = vsel %vm763_vm7, %v1691_v39, 0.0 }
 0x502   : > { %952 = vadd.xlane.f32.xlu0 %v951_v41 }
 0x507   : > { %858 = vrot.lane.b32.xlu1 %v2058_v40, %s1812_s15 }
 0x516   : > { %957 = vrot.lane.b32.xlu0 %v2058_v40, %s1813_s1 }
 0x561   : > { %v854_v42 = vpop.xlane.xlu1 %853 }
 0x562   : > { %1692 = vrcp.f32 %v854_v42 }
 0x568   : > { %v1693_v46 = vpop.eup %1692 }
 0x569   : > { %v856_v48 = vmul.f32 %v1693_v46, %v1689_v26  ;;  %v1677_v46 = vld [vmem:[%s650_s17] ss:$0 sm:$0xff]  ;;  %s2277_s17 = sld [smem:[#allocation10_spill]] }
 0x56b   : > { %v857_v40 = vpack.c.bf16 %v856_v48, %v856_v48 }
 0x56d   : > { %v1028_v43 = vpop.xlane.xlu0 %1027 }
 0x56e   : > { %v1029_v44 = vsub.f32 %v1025_v34, %v1028_v43 }
 0x570   : > { %v1030_v45 = vmul.f32 1.442695, %v1029_v44  ;;  %v1676_v44 = vld [vmem:[%s2276_s0] ss:$0 sm:$0xff] }
 0x572   : > { %1694 = vpow2.f32 %v1030_v45 }
 0x575   : > { %v953_v52 = vpop.xlane.xlu0 %952 }
 0x576   : > { %1696 = vrcp.f32 %v953_v52  ;;  %v1586_v52 = vld [vmem:[%s2023_s20 + $0x30] sm:$0xff] }
 0x578   : > { %v1695_v47 = vpop.eup %1694 }
 0x579   : > { %v859_v49 = vpop.permute.xlu1 %858  ;;  %v1032_v50 = vsel %vm763_vm7, %v1695_v47, 0.0 }
 0x57a   : > { %1033 = vadd.xlane.f32.xlu1 %v1032_v50  ;;  %v864_v51 = vsel %vm802_vm8, %v859_v49, 0  ;;  %v1587_v50 = vld [vmem:[%s2023_s20 + $0x38] sm:$0xff] }
 0x57b   : > { %873 = vmatpush.bf16.msrb.mxu2 %v864_v51  ;;  %1266 = vmatpush.bf16.msra.mxu1 %v1587_v50  ;;  %v1678_v51 = vld [vmem:[%s658_s28] ss:$0 sm:$0xff]  ;;  %s1569_s28 = sshll.u32 %s2277_s17, 3 }
 0x57c   : > { %v1697_v53 = vpop.eup %1696  ;;  %s1292_s29 = scalar_lea.hbm %s2280_s21, %s1569_s28 }
 0x57d   : > { %v955_v54 = vmul.f32 %v1697_v53, %v1691_v39  ;;  %s1296_s30 = sshll.u32 %s1292_s29, 4  ;;  %s1297_s30 = int_to_ptr.hbm [resolvable:$true] %s1296_s30 }
 0x57e   : > { %1515 = vmatmul.msk.bf16.vlgmr.msrb.gmra.mxu2 %vm763_vm7, %v857_v40  ;;  %s1720_s4 = sshra.s32 %s1297_s30, 4  ;;  %s1721_s4 = int_to_ptr.hbm [resolvable:$true] %s1720_s4 }
 0x57f   : > { %v956_v57 = vpack.c.bf16 %v955_v54, %v955_v54  ;;  %1267 = vmatpush.bf16.msra.mxu1 %v1586_v52  ;;  %v1585_v54 = vld [vmem:[%s2023_s20 + $0x28] sm:$0xff]  ;;  %s1722_s26 = scalar_lea.hbm %s1721_s4, 8  ;;  %p1727_p5 = scmp.lt.s32.totalorder %s1721_s4, %s2280_s21 }
 0x580   : > { %p1723_p1 = scmp.ne.s32.totalorder %s1721_s4, %s1722_s26  ;;  %p1728_p6 = scmp.lt.s32.totalorder %s1726_s23, %s1722_s26 }
 0x582   : > { %p1724_p2 = pnand %p1723_p1, %p1939_p3  ;;  %p1729_p7 = por %p1728_p6, %p1727_p5 }
 0x583   : > { %1268 = vmatpush.bf16.msra.mxu1 %v1585_v54 }
 0x584   : > { %p1725_p4 = pneg %p1724_p2 }
 0x586   : > { %p1730_p8 = pnand %p1729_p7, %p1725_p4 }
 0x588   : > { %v958_v55 = vpop.permute.xlu0 %957 }
 0x589   : > { %v963_v56 = vsel %vm802_vm8, %v958_v55, 0 }
 0x58a   : > { %972 = vmatpush.bf16.msra.mxu2 %v963_v56 }
 0x58e   : > { %1520 = vmatmul.msk.bf16.vlgmr.msra.gmra.mxu2 %vm763_vm7, %v956_v57  ;;  %v1584_v57 = vld [vmem:[%s2023_s20 + $0x20] sm:$0xff] }
 0x58f   : > { %1075 = vmatpush.bf16.msrb.mxu2 %v1066_v4  ;;  %1269 = vmatpush.bf16.msra.mxu1 %v1584_v57 }
 0x593   : > { %1270 = vmatpush.bf16.msra.mxu1 %v1583_v61 }
 0x597   : > { %1271 = vmatpush.bf16.msra.mxu1 %v1582_v62 }
 0x5ed   : > { %v1034_v60 = vpop.xlane.xlu1 %1033 }
 0x5ee   : > { %1698 = vrcp.f32 %v1034_v60 }
 0x5f4   : > { %v1699_v63 = vpop.eup %1698 }
 0x5f5   : > { %v1036_v0 = vmul.f32 %v1699_v63, %v1695_v47 }
 0x5f7   : > { %v1037_v2 = vpack.c.bf16 %v1036_v0, %v1036_v0 }
 0x5f9   : > { %1524 = vmatmul.msk.bf16.vlgmr.msrb.gmra.mxu3 %vm763_vm7, %v1037_v2  ;;  %v1581_v2 = vld [vmem:[%s2023_s20 + $0x8] sm:$0xff] }
 0x5fa   : > { %1272 = vmatpush.bf16.msra.mxu1 %v1581_v2 }
 0x601   : > { %v875_v5 = vpop.f32.mrf.mxu2 }
 0x602   : > { %v879_v6 = vpack.c.bf16 %v875_v5, %v875_v5 }
 0x604   : > { %1517 = vmatmul.msk.bf16.vlgmr.msrb.gmra.mxu0 %vm763_vm7, %v879_v6 }
 0x605   : > { %1150 = vmatpush.bf16.msrb.mxu0 %v1579_v33 }
 0x609   : > { %v877_v7 = vpop.f32.mrf.mxu2 }
 0x60a   : > { %v1580_v7 = vld [vmem:[%s2023_s20] sm:$0xff]  ;;  %s2278_s20 = sld [smem:[#allocation7_spill]] }
 0x60b   : > { %1273 = vmatpush.bf16.msra.mxu1 %v1580_v7 }
 0x611   : > { %v974_v8 = vpop.f32.mrf.mxu2 }
 0x612   : > { %v978_v10 = vpack.c.bf16 %v974_v8, %v974_v8 }
 0x614   : > { %1522 = vmatmul.msk.bf16.vlgmr.msra.gmra.mxu0 %vm763_vm7, %v978_v10 }
 0x619   : > { %v976_v11 = vpop.f32.mrf.mxu2 }
 0x67c   : > { %v1055_v12 = vpop.f32.mrf.mxu3 }
 0x67d   : > { %v1059_v13 = vpack.c.bf16 %v1055_v12, %v1055_v12 }
 0x67f   : > { %1526 = vmatmul.msk.bf16.vlgmr.msrb.gmra.mxu2 %vm763_vm7, %v1059_v13 }
 0x681   : > { %v897_v14 = vpop.f32.mrf.mxu0 }
 0x682   : > { %v917_v17 = vadd.f32 %v2094_v25, %v897_v14 }
 0x684   : > { %v1057_v15 = vpop.f32.mrf.mxu3 }
 0x689   : > { %v899_v16 = vpop.f32.mrf.mxu0 }
 0x691   : > { %v996_v18 = vpop.f32.mrf.mxu0 }
 0x692   : > { %v1000_v19 = vadd.f32 %v996_v18, %v917_v17 }
 0x699   : > { %v998_v20 = vpop.f32.mrf.mxu0 }
 0x702   : > { %v1077_v21 = vpop.f32.mrf.mxu2 }
 0x703   : > { %v1081_v22 = vadd.f32 %v1077_v21, %v1000_v19 }
 0x705   : > { %v1082_v24 = vadd.f32 %v1081_v22, %v2030_v1  ;;  %v1578_v1 = vld [vmem:[%s2009_s16] sm:$0xff]  ;;  %s2281_s16 = sand.u32 1, %s2278_s20  }
 0x706   : > { %1151 = vmatpush.bf16.msrb.mxu0 %v1578_v1  ;;  %s1282_s0 = scalar_lea.sflag [#allocation4], %s2281_s16 }
 0x707   : > { %v2125_v26 = vadd.f32 %v1675_v23, %v1082_v24 }
 0x709   : > { %v1090_v27 = vsel %vm679_vm1, %v2125_v26, 0.0 }
 0x70a   : > { %1091 = vadd.xlane.f32.xlu2 %v1090_v27  ;;  %v1079_v25 = vpop.f32.mrf.mxu2 }
 0x77d   : > { %v1092_v28 = vpop.xlane.xlu2 %1091 }
 0x77e   : > { %v1093_v29 = vmul.f32 %v1092_v28, %v2034_v9 }
 0x780   : > { %v1094_v30 = vsub.f32 %v2125_v26, %v1093_v29  ;;  %v1814_v29 = vmov -1.0  }
 0x782   : > { %v1095_v31 = vmul.f32 %v1094_v30, %v1094_v30 }
 0x784   : > { %v1096_v32 = vsel %vm679_vm1, %v1095_v31, 0.0 }
 0x785   : > { %1097 = vadd.xlane.f32.xlu0 %v1096_v32 }
 0x7f8   : > { %v1098_v34 = vpop.xlane.xlu0 %1097 }
 0x7f9   : > { %v1099_v35 = vmul.f32 %v1098_v34, %v2034_v9 }
 0x7fb   : > { %v1100_v36 = vadd.f32 1e-05, %v1099_v35  ;;  %v1679_v35 = vld [vmem:[%s666_s2] ss:$0 sm:$0xff] }
 0x7fd   : > { %1700 = vrsqrt.f32 %v1100_v36  ;;  %vm1107_vm10 = vweird.f32 %v1100_v36 }
 0x803   : > { %v1701_v37 = vpop.eup %1700 }
 0x804   : > { %v1102_v38 = vmul.f32 %v1701_v37, %v1100_v36  ;;  %vm1108_vm9 = vweird.f32 %v1701_v37 }
 0x805   : > { %vm1109_vm11 = vmor %vm1107_vm10, %vm1108_vm9 }
 0x806   : > { %v1103_v39 = vmul.f32 %v1701_v37, %v1102_v38 }
 0x808   : > { %v1104_v41 = vmul.f32 0.5, %v1103_v39 }
 0x80a   : > { %v1105_v42 = vsub.f32 1.5, %v1104_v41 }
 0x80c   : > { %v1106_v43 = vmul.f32 %v1701_v37, %v1105_v42 }
 0x80e   : > { %v1110_v9 = vsel %vm1109_vm11, %v1701_v37, %v1106_v43 }
 0x80f   : > { %v1111_v45 = vmul.f32 %v1110_v9, %v1094_v30 }
 0x811   : > { %v1115_v47 = vmul.f32 %v1676_v44, %v1111_v45 }
 0x813   : > { %v1119_v48 = vadd.f32 %v1677_v46, %v1115_v47 }
 0x815   : > { %v1120_v49 = vpack.c.bf16 %v1119_v48, %v1119_v48 }
 0x817   : > { %1535 = vmatmul.msk.bf16.vlgmr.msrb.gmra.mxu0 %vm679_vm1, %v1120_v49 }
 0x894   : > { %v1153_v40 = vpop.f32.mrf.mxu0 }
 0x895   : > { %v1154_v53 = vadd.f32 %v1678_v51, %v1153_v40 }
 0x897   : > { %v1158_v55 = vmul.f32 0.70710677, %v1154_v53  ;;  %v1157_v32 = vmul.f32 0.5, %v1154_v53 }
 0x899   : > { %v1161_v56 = vand.u32 2147483647, %v1158_v55  ;;  %vm1159_vm0 = vcmp.ge.f32.partialorder %v1158_v55, 0.0 }
 0x89a   : > { %v1160_v30 = vsel %vm1159_vm0, 1.0, %v1814_v29 }
 0x89b   : > { %v1162_v58 = vmul.f32 0.3275911, %v1161_v56  ;;  %v1188_v13 = vsub.f32 0.0, %v1161_v56 }
 0x89c   : > { %v1155_v59 = vpop.f32.mrf.mxu0 }
 0x89d   : > { %v1163_v60 = vadd.f32 1.0, %v1162_v58  ;;  %v1189_v16 = vmul.f32 %v1188_v13, %v1161_v56 }
 0x89f   : > { %1702 = vrcp.f32 %v1163_v60  ;;  %v1175_v4 = vand.u32 2147483648, %v1163_v60  ;;  %v1173_v6 = vand.u32 2147483647, %v1163_v60  ;;  %vm1169_vm13 = vweird.f32 %v1163_v60 }
 0x8a0   : > { %v1190_v19 = vmul.f32 1.442695, %v1189_v16 }
 0x8a1   : > { %v1176_v10 = vor.u32 1.1754944e-38, %v1175_v4  ;;  %vm1174_vm15 = vcmp.eq.f32.partialorder %v1173_v6, 8.507059e+37 }
 0x8a2   : > { %1704 = vpow2.f32 %v1190_v19 }
 0x8a5   : > { %v1703_v63 = vpop.eup %1702 }
 0x8a6   : > { %v1165_v0 = vmul.f32 %v1703_v63, %v1163_v60  ;;  %vm1170_vm12 = vweird.f32 %v1703_v63 }
 0x8a7   : > { %vm1171_vm14 = vmor %vm1169_vm13, %vm1170_vm12 }
 0x8a8   : > { %v1166_v3 = vsub.f32 1.0, %v1165_v0  ;;  %v1705_v27 = vpop.eup %1704 }
 0x8aa   : > { %v1167_v5 = vmul.f32 %v1703_v63, %v1166_v3 }
 0x8ac   : > { %v1168_v8 = vadd.f32 %v1703_v63, %v1167_v5 }
 0x8ae   : > { %v1172_v11 = vsel %vm1171_vm14, %v1703_v63, %v1168_v8 }
 0x8af   : > { %v1177_v12 = vsel %vm1174_vm15, %v1176_v10, %v1172_v11 }
 0x8b0   : > { %v1179_v14 = vmul.f32 1.0614054, %v1177_v12 }
 0x8b2   : > { %v1180_v15 = vadd.f32 -1.4531521, %v1179_v14 }
 0x8b4   : > { %v1181_v17 = vmul.f32 %v1180_v15, %v1177_v12 }
 0x8b6   : > { %v1182_v18 = vadd.f32 1.4214138, %v1181_v17 }
 0x8b8   : > { %v1183_v20 = vmul.f32 %v1182_v18, %v1177_v12 }
 0x8ba   : > { %v1184_v21 = vadd.f32 -0.28449672, %v1183_v20 }
 0x8bc   : > { %v1185_v22 = vmul.f32 %v1184_v21, %v1177_v12 }
 0x8be   : > { %v1186_v23 = vadd.f32 0.2548296, %v1185_v22 }
 0x8c0   : > { %v1187_v24 = vmul.f32 %v1186_v23, %v1177_v12 }
 0x8c2   : > { %v1192_v25 = vmul.f32 %v1705_v27, %v1187_v24 }
 0x8c4   : > { %v1193_v28 = vsub.f32 1.0, %v1192_v25 }
 0x8c6   : > { %v1194_v31 = vmul.f32 %v1193_v28, %v1160_v30 }
 0x8c8   : > { %v1195_v33 = vadd.f32 1.0, %v1194_v31 }
 0x8ca   : > { %v1196_v1 = vmul.f32 %v1195_v33, %v1157_v32 }
 0x8cc   : > { %v1197_v34 = vpack.c.bf16 %v1196_v1, %v1196_v1 }
 0x8ce   : > { %1274 = vmatmul.bf16.vlgmr.msra.gmra.mxu1 %v1197_v34 }
 0x94b   : > { %v1275_v36 = vpop.f32.mrf.mxu1 }
 0x94c   : > { %v1276_v37 = vadd.f32 %v1679_v35, %v1275_v36 }
 0x94e   : > { %v1279_v38 = vadd.f32 %v1276_v37, %v2125_v26 }
 0x950   : > { %1280 = vst.msk [vmem:[%s2025_s25] sm:$0xff] %vm679_vm1, %v1279_v38 }
 0x951   : > { %1733 = shalt.err (!%p1730_p8)
}
 0x952   : > { %1588 = dma.vmem_to_hbm [thread:$0]  (%p1939_p3), %s1295_s14, 128, %s1297_s30, %s1282_s0  }
 0x953   : > { %v1277_v26 = vpop.f32.mrf.mxu1 }
 0x954 PF: > { %s2282_s25 = sld [smem:[#allocation13_spill]] }
 0x955   : > { %s2283_s20 = sld [smem:[#allocation6_spill]] }
 0x95a   : > { %p1594_p10 = scmp.ge.s32.totalorder %s2282_s25, 2 }
 0x95b   : > { %s1308_s24 = sand.u32 1, %s2283_s20  }
 0x95c   : > { %p1591_p11 = pnand %p1594_p10, %p1949_p9  ;;  %s1309_s18 = scalar_lea.sflag [#allocation4], %s1308_s24 }
 0x95e   : > { %p1592_p12 = pneg %p1591_p11 }
 0x960   : > { %1767 = dma.done.wait (%p1592_p12), %s1309_s18, 128  }
 0x961   : > { %1769 = vsyncadd (%p1592_p12), %s1309_s18, 4294967168  ;;  %s27_s20 = sadd.s32 1, %s2282_s25   ;;  %s2285_s29 = sld [smem:[#allocation7_spill]] }
 0x962   : > { %p24_p13 = scmp.ge.s32.totalorder %s27_s20, 6   ;;  %s2286_s30 = sld [smem:[#allocation8_spill]] }
 0x963   : > { %s2287_s15 = sld [smem:[#allocation18_spill]] }
 0x964   : > { %s2288_s16 = sld [smem:[#allocation11_spill]]  ;;  %26 = sbr.rel (!%p24_p13) target bundleno = 11 (0xb), region = 154 }
 0x965   : > { %s2289_s17 = sld [smem:[#allocation12_spill]] }
 0x966   : > { %s2290_s18 = sld [smem:[#allocation14_spill]] }
 0x967   : > { %s2291_s19 = sld [smem:[#allocation16_spill]] }
 0x969   :  { %1315 = vsyncpa [#allocation4], 1 }
 0x96a   :  { %1317 = vsyncpa [#allocation4 + $0x1], 1 }

</bundles_post_ra>
